<compile_context>
chip_gen: v6e
topology: v6e:2x2x1
jax: 0.10.0
libtpu: 0.0.40
codegen_flags: <defaults>
</compile_context>

<pallas_src>
import jax
import jax.numpy as jnp
from jax.experimental import pallas as pl
from jax.experimental.pallas import tpu as pltpu

HIDDEN = 256          # fixed by the PyTorch module
_LANE = 128           # TPU lane width
_PACK = 16            # bf16 sublane packing (also a multiple of the f32 8)
_LAST_N_CHUNK = 2048  # lane-chunk for the final layer's output dimension


def _round_up(n, m):
    return ((n + m - 1) // m) * m


def autoencoder_kernel(x_ref,
                       w1_ref, b1_ref,
                       w2_ref, b2_ref,
                       w3_ref, b3_ref,
                       w4_ref, b4_ref,
                       out_ref):
    """Fused 4x (Linear + ReLU) on one [bt, d_in_p] batch tile.

    MXU matmuls run in the weights' dtype (bf16); accumulation, bias add and
    ReLU happen in f32.  The final layer is chunked along its output (lane)
    dimension so the live pre-ReLU f32 block never exceeds bt x _LAST_N_CHUNK.
    """
    cdt = w1_ref.dtype                       # compute (MXU) dtype, e.g. bf16
    x = x_ref[...].astype(cdt)               # cast in-kernel (no wrapper pass)

    # encoder layer 1: Linear(input_dim, 256) + ReLU
    h1 = jnp.dot(x, w1_ref[...], preferred_element_type=jnp.float32) + b1_ref[...]
    h1 = jnp.maximum(h1, 0.0).astype(cdt)

    # encoder layer 2: Linear(256, encoding_dim) + ReLU
    z = jnp.dot(h1, w2_ref[...], preferred_element_type=jnp.float32) + b2_ref[...]
    z = jnp.maximum(z, 0.0).astype(cdt)

    # decoder layer 1: Linear(encoding_dim, 256) + ReLU
    h2 = jnp.dot(z, w3_ref[...], preferred_element_type=jnp.float32) + b3_ref[...]
    h2 = jnp.maximum(h2, 0.0).astype(cdt)

    # decoder layer 2: Linear(256, input_dim) + ReLU, lane-chunked output
    d_out = out_ref.shape[1]
    step = min(d_out, _LAST_N_CHUNK)         # d_out and step are multiples of 128
    for n0 in range(0, d_out, step):
        nt = min(step, d_out - n0)
        y = (jnp.dot(h2, w4_ref[:, n0:n0 + nt],
                     preferred_element_type=jnp.float32)
             + b4_ref[:, n0:n0 + nt])
        out_ref[:, n0:n0 + nt] = jnp.maximum(y, 0.0).astype(out_ref.dtype)


def _vmem_budget_bytes():
    """~72% of this generation's VMEM (v7x: 64 MiB, v5e/v6e: 128 MiB)."""
    try:
        cap = pltpu.get_tpu_info().vmem_capacity_bytes
    except Exception:
        cap = 64 * 1024 * 1024   # conservative fallback (v7x per-TC VMEM)
    return int(0.72 * cap)


def _vmem_estimate(bt, d_in_p, enc_p, cbytes, out_bytes, param_bytes, param_bufs):
    """Rough VMEM footprint for one pipelined grid step (conservative: f32 x)."""
    n_chunk = min(d_in_p, _LAST_N_CHUNK)
    est = 2 * bt * d_in_p * 4                       # double-buffered x tile (f32 worst case)
    est += 2 * bt * d_in_p * out_bytes              # double-buffered out tile
    est += param_bufs * param_bytes                 # resident weights/biases
    est += bt * (2 * HIDDEN + enc_p) * (4 + cbytes) # h1 / z / h2 (f32 + bf16 copies)
    est += bt * n_chunk * 4                         # last-layer pre-ReLU f32 chunk
    return est


def autoencoder_forward(x, params, *, batch_tile=512,
                        compute_dtype=jnp.bfloat16, out_dtype=None):
    """x: [B, input_dim] float32.  params: dict of f32 weights/biases (see init)."""
    B, input_dim = x.shape
    enc = params["w2"].shape[1]
    out_dtype = x.dtype if out_dtype is None else out_dtype
    cbytes = jnp.dtype(compute_dtype).itemsize
    out_bytes = jnp.dtype(out_dtype).itemsize

    # --- lane-dense padded feature dims -------------------------------------
    d_in_p = _round_up(input_dim, _LANE)
    enc_p = _round_up(enc, _LANE)

    # --- pad + cast parameters (zero padding is exact: ReLU(0) == 0) --------
    def padw(w, rows, cols):
        return jnp.pad(w, ((0, rows - w.shape[0]),
                           (0, cols - w.shape[1]))).astype(compute_dtype)

    def padb(b, cols):
        return jnp.pad(b, ((0, 0), (0, cols - b.shape[1]))).astype(jnp.float32)

    w1 = padw(params["w1"], d_in_p, HIDDEN); b1 = padb(params["b1"], HIDDEN)
    w2 = padw(params["w2"], HIDDEN, enc_p);  b2 = padb(params["b2"], enc_p)
    w3 = padw(params["w3"], enc_p, HIDDEN);  b3 = padb(params["b3"], HIDDEN)
    w4 = padw(params["w4"], HIDDEN, d_in_p); b4 = padb(params["b4"], d_in_p)
    param_bytes = (cbytes * (w1.size + w2.size + w3.size + w4.size)
                   + 4 * (b1.size + b2.size + b3.size + b4.size))

    # --- batch tile selection (bf16 packing multiple, >=2 steps if free) ----
    budget = _vmem_budget_bytes()
    B_pk = _round_up(B, _PACK)
    bt = max(_PACK, min(_round_up(batch_tile, _PACK), B_pk))
    if bt == B_pk and B_pk >= 2 * _PACK and (B_pk // 2) % _PACK == 0:
        bt = B_pk // 2          # >=2 grid steps -> megacore sharding on v7x
    # shrink tile until the rough VMEM estimate fits the generation's budget
    while bt > _PACK and _vmem_estimate(bt, d_in_p, enc_p, cbytes,
                                        out_bytes, param_bytes, 2) > budget:
        bt = max(_PACK, _round_up(bt // 2, _PACK))

    B_p = _round_up(B, bt)
    n_steps = B_p // bt

    # --- input: avoid the wrapper pad/cast HBM pass when already aligned ----
    needs_pad = (B_p != B) or (d_in_p != input_dim)
    if needs_pad:
        x_in = jnp.pad(x, ((0, B_p - B),
                           (0, d_in_p - input_dim))).astype(compute_dtype)
    else:
        x_in = x   # f32, cast to bf16 inside the kernel

    # --- cost estimate + VMEM limit ------------------------------------------
    flops = 2 * B_p * (d_in_p * HIDDEN + HIDDEN * enc_p
                       + enc_p * HIDDEN + HIDDEN * d_in_p)
    bytes_accessed = (x_in.size * jnp.dtype(x_in.dtype).itemsize
                      + param_bytes + B_p * d_in_p * out_bytes)
    est = _vmem_estimate(bt, d_in_p, enc_p, cbytes, out_bytes, param_bytes, 2)
    vmem_limit = int(min(budget, max(32 * 1024 * 1024, 2 * est)))

    # --- specs ----------------------------------------------------------------
    def resident(arr, single_buffer):
        # whole-array block, constant index map -> DMA'd once, VMEM-resident.
        if single_buffer:
            return pl.BlockSpec(arr.shape, lambda i: (0, 0),
                                pipeline_mode=pl.Buffered(1))
        return pl.BlockSpec(arr.shape, lambda i: (0, 0))

    def build(single_buffer_params):
        in_specs = ([pl.BlockSpec((bt, d_in_p), lambda i: (i, 0))] +
                    [resident(a, single_buffer_params)
                     for a in (w1, b1, w2, b2, w3, b3, w4, b4)])
        return pl.pallas_call(
            autoencoder_kernel,
            out_shape=jax.ShapeDtypeStruct((B_p, d_in_p), out_dtype),
            grid_spec=pl.GridSpec(
                grid=(n_steps,),
                in_specs=in_specs,
                out_specs=pl.BlockSpec((bt, d_in_p), lambda i: (i, 0)),
            ),
            compiler_params=pltpu.CompilerParams(
                dimension_semantics=("parallel",),
                vmem_limit_bytes=vmem_limit,
            ),
            cost_estimate=pl.CostEstimate(
                flops=int(flops), transcendentals=0,
                bytes_accessed=int(bytes_accessed)),
        )

    args = (x_in, w1, b1, w2, b2, w3, b3, w4, b4)
    try:
        out_p = build(single_buffer_params=True)(*args)
    except Exception:
        # Some builds may reject Buffered(1); fall back to default buffering.
        out_p = build(single_buffer_params=False)(*args)

    # strip batch / feature padding
    return out_p[:B, :input_dim]


def init_params(key, input_dim, encoding_dim, hidden=HIDDEN, dtype=jnp.float32):
    """Parameter init mimicking nn.Linear's U(-1/sqrt(fan_in), +1/sqrt(fan_in))."""
    def linear(k, fan_in, fan_out):
        kw, kb = jax.random.split(k)
        bound = 1.0 / jnp.sqrt(fan_in)
        w = jax.random.uniform(kw, (fan_in, fan_out), dtype, -bound, bound)
        b = jax.random.uniform(kb, (1, fan_out), dtype, -bound, bound)
        return w, b

    k1, k2, k3, k4 = jax.random.split(key, 4)
    w1, b1 = linear(k1, input_dim, hidden)
    w2, b2 = linear(k2, hidden, encoding_dim)
    w3, b3 = linear(k3, encoding_dim, hidden)
    w4, b4 = linear(k4, hidden, input_dim)
    return {"w1": w1, "b1": b1, "w2": w2, "b2": b2,
            "w3": w3, "b3": b3, "w4": w4, "b4": b4}


def reference_forward(x, p):
    """Pure-JAX f32 reference of the PyTorch forward pass."""
    h = jnp.maximum(x @ p["w1"] + p["b1"], 0.0)
    z = jnp.maximum(h @ p["w2"] + p["b2"], 0.0)
    h2 = jnp.maximum(z @ p["w3"] + p["b3"], 0.0)
    return jnp.maximum(h2 @ p["w4"] + p["b4"], 0.0)


if __name__ == "__main__":
    key = jax.random.PRNGKey(0)
    kx1, kp1, kx2, kp2 = jax.random.split(key, 4)

    # --- aligned shapes: no wrapper pad, 2-step "parallel" grid --------------
    input_dim, encoding_dim, batch = 128, 32, 32
    x = jax.random.normal(kx1, (batch, input_dim), dtype=jnp.float32)
    params = init_params(kp1, input_dim, encoding_dim)
    ref = reference_forward(x, params)
    out = jax.block_until_ready(autoencoder_forward(x, params))
    assert out.shape == (batch, input_dim)
    # bf16 matmuls -> loosened tolerance vs f32 reference
    assert jnp.allclose(out, ref, atol=5e-2, rtol=5e-2), (
        f"mismatch vs reference (max abs err {jnp.max(jnp.abs(out - ref))})")

    # --- misaligned shapes: exercises the zero-padding path ------------------
    input_dim2, encoding_dim2, batch2 = 100, 20, 13
    x2 = jax.random.normal(kx2, (batch2, input_dim2), dtype=jnp.float32)
    params2 = init_params(kp2, input_dim2, encoding_dim2)
    ref2 = reference_forward(x2, params2)
    out2 = jax.block_until_ready(
        autoencoder_forward(x2, params2, batch_tile=16))
    assert out2.shape == (batch2, input_dim2)
    assert jnp.allclose(out2, ref2, atol=5e-2, rtol=5e-2), (
        f"padded-path mismatch (max abs err {jnp.max(jnp.abs(out2 - ref2))})")

    print("KERNEL_OK")
</pallas_src>

<mosaic_0001>
module attributes {stable_mosaic.version = 11 : i64} {
  func.func @autoencoder_kernel(%arg0: i32, %arg1: memref<16x128xf32, #tpu.memory_space<vmem>>, %arg2: memref<128x256xbf16, #tpu.memory_space<vmem>>, %arg3: memref<1x256xf32, #tpu.memory_space<vmem>>, %arg4: memref<256x128xbf16, #tpu.memory_space<vmem>>, %arg5: memref<1x128xf32, #tpu.memory_space<vmem>>, %arg6: memref<128x256xbf16, #tpu.memory_space<vmem>>, %arg7: memref<1x256xf32, #tpu.memory_space<vmem>>, %arg8: memref<256x128xbf16, #tpu.memory_space<vmem>>, %arg9: memref<1x128xf32, #tpu.memory_space<vmem>>, %arg10: memref<16x128xf32, #tpu.memory_space<vmem>>) attributes {dimension_semantics = [#tpu.dimension_semantics<parallel>], iteration_bounds = array<i64: 2>, scalar_prefetch = 0 : i64, scratch_operands = 0 : i64, tpu.core_type = #tpu.core_type<tc>, window_params = [{transform_indices = @transform_0, window_bounds = array<i64: 16, 128>}, {pipeline_mode = #tpu.pipeline_mode<synchronous>, transform_indices = @transform_1, window_bounds = array<i64: 128, 256>}, {pipeline_mode = #tpu.pipeline_mode<synchronous>, transform_indices = @transform_2, window_bounds = array<i64: 1, 256>}, {pipeline_mode = #tpu.pipeline_mode<synchronous>, transform_indices = @transform_3, window_bounds = array<i64: 256, 128>}, {pipeline_mode = #tpu.pipeline_mode<synchronous>, transform_indices = @transform_4, window_bounds = array<i64: 1, 128>}, {pipeline_mode = #tpu.pipeline_mode<synchronous>, transform_indices = @transform_5, window_bounds = array<i64: 128, 256>}, {pipeline_mode = #tpu.pipeline_mode<synchronous>, transform_indices = @transform_6, window_bounds = array<i64: 1, 256>}, {pipeline_mode = #tpu.pipeline_mode<synchronous>, transform_indices = @transform_7, window_bounds = array<i64: 256, 128>}, {pipeline_mode = #tpu.pipeline_mode<synchronous>, transform_indices = @transform_8, window_bounds = array<i64: 1, 128>}, {transform_indices = @transform_9, window_bounds = array<i64: 16, 128>}]} {
    %c0 = arith.constant 0 : index
    %c0_0 = arith.constant 0 : index
    %0 = vector.load %arg1[%c0, %c0_0] : memref<16x128xf32, #tpu.memory_space<vmem>>, vector<16x128xf32>
    %1 = arith.truncf %0 : vector<16x128xf32> to vector<16x128xbf16>
    %c0_1 = arith.constant 0 : index
    %c0_2 = arith.constant 0 : index
    %2 = vector.load %arg2[%c0_1, %c0_2] : memref<128x256xbf16, #tpu.memory_space<vmem>>, vector<128x256xbf16>
    %cst = arith.constant dense<0.000000e+00> : vector<16x256xf32>
    %3 = tpu.matmul %1, %2, %cst {dimension_numbers = #tpu.dot_dimension_numbers<[1], [0], [0], [1], [0, 0, 1, 1], [], []>} : vector<16x128xbf16>, vector<128x256xbf16>, vector<16x256xf32> -> vector<16x256xf32>
    %c0_3 = arith.constant 0 : index
    %c0_4 = arith.constant 0 : index
    %4 = vector.load %arg3[%c0_3, %c0_4] : memref<1x256xf32, #tpu.memory_space<vmem>>, vector<1x256xf32>
    %5 = vector.broadcast %4 : vector<1x256xf32> to vector<16x256xf32>
    %6 = arith.addf %3, %5 : vector<16x256xf32>
    %cst_5 = arith.constant 0.000000e+00 : f32
    %7 = vector.broadcast %cst_5 : f32 to vector<16x256xf32>
    %8 = arith.maximumf %6, %7 : vector<16x256xf32>
    %9 = arith.truncf %8 : vector<16x256xf32> to vector<16x256xbf16>
    %c0_6 = arith.constant 0 : index
    %c0_7 = arith.constant 0 : index
    %10 = vector.load %arg4[%c0_6, %c0_7] : memref<256x128xbf16, #tpu.memory_space<vmem>>, vector<256x128xbf16>
    %cst_8 = arith.constant dense<0.000000e+00> : vector<16x128xf32>
    %11 = tpu.matmul %9, %10, %cst_8 {dimension_numbers = #tpu.dot_dimension_numbers<[1], [0], [0], [1], [0, 0, 1, 1], [], []>} : vector<16x256xbf16>, vector<256x128xbf16>, vector<16x128xf32> -> vector<16x128xf32>
    %c0_9 = arith.constant 0 : index
    %c0_10 = arith.constant 0 : index
    %12 = vector.load %arg5[%c0_9, %c0_10] : memref<1x128xf32, #tpu.memory_space<vmem>>, vector<1x128xf32>
    %13 = vector.broadcast %12 : vector<1x128xf32> to vector<16x128xf32>
    %14 = arith.addf %11, %13 : vector<16x128xf32>
    %cst_11 = arith.constant 0.000000e+00 : f32
    %15 = vector.broadcast %cst_11 : f32 to vector<16x128xf32>
    %16 = arith.maximumf %14, %15 : vector<16x128xf32>
    %17 = arith.truncf %16 : vector<16x128xf32> to vector<16x128xbf16>
    %c0_12 = arith.constant 0 : index
    %c0_13 = arith.constant 0 : index
    %18 = vector.load %arg6[%c0_12, %c0_13] : memref<128x256xbf16, #tpu.memory_space<vmem>>, vector<128x256xbf16>
    %cst_14 = arith.constant dense<0.000000e+00> : vector<16x256xf32>
    %19 = tpu.matmul %17, %18, %cst_14 {dimension_numbers = #tpu.dot_dimension_numbers<[1], [0], [0], [1], [0, 0, 1, 1], [], []>} : vector<16x128xbf16>, vector<128x256xbf16>, vector<16x256xf32> -> vector<16x256xf32>
    %c0_15 = arith.constant 0 : index
    %c0_16 = arith.constant 0 : index
    %20 = vector.load %arg7[%c0_15, %c0_16] : memref<1x256xf32, #tpu.memory_space<vmem>>, vector<1x256xf32>
    %21 = vector.broadcast %20 : vector<1x256xf32> to vector<16x256xf32>
    %22 = arith.addf %19, %21 : vector<16x256xf32>
    %cst_17 = arith.constant 0.000000e+00 : f32
    %23 = vector.broadcast %cst_17 : f32 to vector<16x256xf32>
    %24 = arith.maximumf %22, %23 : vector<16x256xf32>
    %25 = arith.truncf %24 : vector<16x256xf32> to vector<16x256xbf16>
    %c0_18 = arith.constant 0 : index
    %c0_19 = arith.constant 0 : index
    %26 = vector.load %arg8[%c0_18, %c0_19] : memref<256x128xbf16, #tpu.memory_space<vmem>>, vector<256x128xbf16>
    %cst_20 = arith.constant dense<0.000000e+00> : vector<16x128xf32>
    %27 = tpu.matmul %25, %26, %cst_20 {dimension_numbers = #tpu.dot_dimension_numbers<[1], [0], [0], [1], [0, 0, 1, 1], [], []>} : vector<16x256xbf16>, vector<256x128xbf16>, vector<16x128xf32> -> vector<16x128xf32>
    %c0_21 = arith.constant 0 : index
    %c0_22 = arith.constant 0 : index
    %28 = vector.load %arg9[%c0_21, %c0_22] : memref<1x128xf32, #tpu.memory_space<vmem>>, vector<1x128xf32>
    %29 = vector.broadcast %28 : vector<1x128xf32> to vector<16x128xf32>
    %30 = arith.addf %27, %29 : vector<16x128xf32>
    %cst_23 = arith.constant 0.000000e+00 : f32
    %31 = vector.broadcast %cst_23 : f32 to vector<16x128xf32>
    %32 = arith.maximumf %30, %31 : vector<16x128xf32>
    %c0_24 = arith.constant 0 : index
    %c0_25 = arith.constant 0 : index
    %33 = vector.load %arg10[%c0_24, %c0_25] : memref<16x128xf32, #tpu.memory_space<vmem>>, vector<16x128xf32>
    tpu.vector_store %arg10[%c0_24, %c0_25], %32 {strides = array<i32>} : memref<16x128xf32, #tpu.memory_space<vmem>>, vector<16x128xf32>,
    return
  }
  func.func @transform_0(%arg0: i32) -> (i32, i32) {
    %c0_i32 = arith.constant 0 : i32
    %c0_i32_0 = arith.constant 0 : i32
    return %arg0, %c0_i32 : i32, i32
  }
  func.func @transform_1(%arg0: i32) -> (i32, i32) {
    %c0_i32 = arith.constant 0 : i32
    %c0_i32_0 = arith.constant 0 : i32
    %c0_i32_1 = arith.constant 0 : i32
    return %c0_i32, %c0_i32_0 : i32, i32
  }
  func.func @transform_2(%arg0: i32) -> (i32, i32) {
    %c0_i32 = arith.constant 0 : i32
    %c0_i32_0 = arith.constant 0 : i32
    %c0_i32_1 = arith.constant 0 : i32
    return %c0_i32, %c0_i32_0 : i32, i32
  }
  func.func @transform_3(%arg0: i32) -> (i32, i32) {
    %c0_i32 = arith.constant 0 : i32
    %c0_i32_0 = arith.constant 0 : i32
    %c0_i32_1 = arith.constant 0 : i32
    return %c0_i32, %c0_i32_0 : i32, i32
  }
  func.func @transform_4(%arg0: i32) -> (i32, i32) {
    %c0_i32 = arith.constant 0 : i32
    %c0_i32_0 = arith.constant 0 : i32
    %c0_i32_1 = arith.constant 0 : i32
    return %c0_i32, %c0_i32_0 : i32, i32
  }
  func.func @transform_5(%arg0: i32) -> (i32, i32) {
    %c0_i32 = arith.constant 0 : i32
    %c0_i32_0 = arith.constant 0 : i32
    %c0_i32_1 = arith.constant 0 : i32
    return %c0_i32, %c0_i32_0 : i32, i32
  }
  func.func @transform_6(%arg0: i32) -> (i32, i32) {
    %c0_i32 = arith.constant 0 : i32
    %c0_i32_0 = arith.constant 0 : i32
    %c0_i32_1 = arith.constant 0 : i32
    return %c0_i32, %c0_i32_0 : i32, i32
  }
  func.func @transform_7(%arg0: i32) -> (i32, i32) {
    %c0_i32 = arith.constant 0 : i32
    %c0_i32_0 = arith.constant 0 : i32
    %c0_i32_1 = arith.constant 0 : i32
    return %c0_i32, %c0_i32_0 : i32, i32
  }
  func.func @transform_8(%arg0: i32) -> (i32, i32) {
    %c0_i32 = arith.constant 0 : i32
    %c0_i32_0 = arith.constant 0 : i32
    %c0_i32_1 = arith.constant 0 : i32
    return %c0_i32, %c0_i32_0 : i32, i32
  }
  func.func @transform_9(%arg0: i32) -> (i32, i32) {
    %c0_i32 = arith.constant 0 : i32
    %c0_i32_0 = arith.constant 0 : i32
    return %arg0, %c0_i32 : i32, i32
  }
}

module attributes {stable_mosaic.version = 11 : i64} {
  func.func @autoencoder_kernel(%arg0: i32, %arg1: memref<16x128xf32, #tpu.memory_space<vmem>>, %arg2: memref<128x256xbf16, #tpu.memory_space<vmem>>, %arg3: memref<1x256xf32, #tpu.memory_space<vmem>>, %arg4: memref<256x128xbf16, #tpu.memory_space<vmem>>, %arg5: memref<1x128xf32, #tpu.memory_space<vmem>>, %arg6: memref<128x256xbf16, #tpu.memory_space<vmem>>, %arg7: memref<1x256xf32, #tpu.memory_space<vmem>>, %arg8: memref<256x128xbf16, #tpu.memory_space<vmem>>, %arg9: memref<1x128xf32, #tpu.memory_space<vmem>>, %arg10: memref<16x128xf32, #tpu.memory_space<vmem>>) attributes {dimension_semantics = [#tpu.dimension_semantics<parallel>], iteration_bounds = array<i64: 2>, scalar_prefetch = 0 : i64, scratch_operands = 0 : i64, tpu.core_type = #tpu.core_type<tc>, window_params = [{transform_indices = @transform_0, window_bounds = array<i64: 16, 128>}, {pipeline_mode = #tpu.pipeline_mode<synchronous>, transform_indices = @transform_1, window_bounds = array<i64: 128, 256>}, {pipeline_mode = #tpu.pipeline_mode<synchronous>, transform_indices = @transform_2, window_bounds = array<i64: 1, 256>}, {pipeline_mode = #tpu.pipeline_mode<synchronous>, transform_indices = @transform_3, window_bounds = array<i64: 256, 128>}, {pipeline_mode = #tpu.pipeline_mode<synchronous>, transform_indices = @transform_4, window_bounds = array<i64: 1, 128>}, {pipeline_mode = #tpu.pipeline_mode<synchronous>, transform_indices = @transform_5, window_bounds = array<i64: 128, 256>}, {pipeline_mode = #tpu.pipeline_mode<synchronous>, transform_indices = @transform_6, window_bounds = array<i64: 1, 256>}, {pipeline_mode = #tpu.pipeline_mode<synchronous>, transform_indices = @transform_7, window_bounds = array<i64: 256, 128>}, {pipeline_mode = #tpu.pipeline_mode<synchronous>, transform_indices = @transform_8, window_bounds = array<i64: 1, 128>}, {transform_indices = @transform_9, window_bounds = array<i64: 16, 128>}]} {
    %c0 = arith.constant 0 : index
    %c0_0 = arith.constant 0 : index
    %0 = vector.load %arg1[%c0, %c0_0] : memref<16x128xf32, #tpu.memory_space<vmem>>, vector<16x128xf32>
    %1 = arith.truncf %0 : vector<16x128xf32> to vector<16x128xbf16>
    %c0_1 = arith.constant 0 : index
    %c0_2 = arith.constant 0 : index
    %2 = vector.load %arg2[%c0_1, %c0_2] : memref<128x256xbf16, #tpu.memory_space<vmem>>, vector<128x256xbf16>
    %cst = arith.constant dense<0.000000e+00> : vector<16x256xf32>
    %3 = tpu.matmul %1, %2, %cst {dimension_numbers = #tpu.dot_dimension_numbers<[1], [0], [0], [1], [0, 0, 1, 1], [], []>} : vector<16x128xbf16>, vector<128x256xbf16>, vector<16x256xf32> -> vector<16x256xf32>
    %c0_3 = arith.constant 0 : index
    %c0_4 = arith.constant 0 : index
    %4 = vector.load %arg3[%c0_3, %c0_4] : memref<1x256xf32, #tpu.memory_space<vmem>>, vector<1x256xf32>
    %5 = vector.broadcast %4 : vector<1x256xf32> to vector<16x256xf32>
    %6 = arith.addf %3, %5 : vector<16x256xf32>
    %cst_5 = arith.constant 0.000000e+00 : f32
    %7 = vector.broadcast %cst_5 : f32 to vector<16x256xf32>
    %8 = arith.maximumf %6, %7 : vector<16x256xf32>
    %9 = arith.truncf %8 : vector<16x256xf32> to vector<16x256xbf16>
    %c0_6 = arith.constant 0 : index
    %c0_7 = arith.constant 0 : index
    %10 = vector.load %arg4[%c0_6, %c0_7] : memref<256x128xbf16, #tpu.memory_space<vmem>>, vector<256x128xbf16>
    %cst_8 = arith.constant dense<0.000000e+00> : vector<16x128xf32>
    %11 = tpu.matmul %9, %10, %cst_8 {dimension_numbers = #tpu.dot_dimension_numbers<[1], [0], [0], [1], [0, 0, 1, 1], [], []>} : vector<16x256xbf16>, vector<256x128xbf16>, vector<16x128xf32> -> vector<16x128xf32>
    %c0_9 = arith.constant 0 : index
    %c0_10 = arith.constant 0 : index
    %12 = vector.load %arg5[%c0_9, %c0_10] : memref<1x128xf32, #tpu.memory_space<vmem>>, vector<1x128xf32>
    %13 = vector.broadcast %12 : vector<1x128xf32> to vector<16x128xf32>
    %14 = arith.addf %11, %13 : vector<16x128xf32>
    %cst_11 = arith.constant 0.000000e+00 : f32
    %15 = vector.broadcast %cst_11 : f32 to vector<16x128xf32>
    %16 = arith.maximumf %14, %15 : vector<16x128xf32>
    %17 = arith.truncf %16 : vector<16x128xf32> to vector<16x128xbf16>
    %c0_12 = arith.constant 0 : index
    %c0_13 = arith.constant 0 : index
    %18 = vector.load %arg6[%c0_12, %c0_13] : memref<128x256xbf16, #tpu.memory_space<vmem>>, vector<128x256xbf16>
    %cst_14 = arith.constant dense<0.000000e+00> : vector<16x256xf32>
    %19 = tpu.matmul %17, %18, %cst_14 {dimension_numbers = #tpu.dot_dimension_numbers<[1], [0], [0], [1], [0, 0, 1, 1], [], []>} : vector<16x128xbf16>, vector<128x256xbf16>, vector<16x256xf32> -> vector<16x256xf32>
    %c0_15 = arith.constant 0 : index
    %c0_16 = arith.constant 0 : index
    %20 = vector.load %arg7[%c0_15, %c0_16] : memref<1x256xf32, #tpu.memory_space<vmem>>, vector<1x256xf32>
    %21 = vector.broadcast %20 : vector<1x256xf32> to vector<16x256xf32>
    %22 = arith.addf %19, %21 : vector<16x256xf32>
    %cst_17 = arith.constant 0.000000e+00 : f32
    %23 = vector.broadcast %cst_17 : f32 to vector<16x256xf32>
    %24 = arith.maximumf %22, %23 : vector<16x256xf32>
    %25 = arith.truncf %24 : vector<16x256xf32> to vector<16x256xbf16>
    %c0_18 = arith.constant 0 : index
    %c0_19 = arith.constant 0 : index
    %26 = vector.load %arg8[%c0_18, %c0_19] : memref<256x128xbf16, #tpu.memory_space<vmem>>, vector<256x128xbf16>
    %cst_20 = arith.constant dense<0.000000e+00> : vector<16x128xf32>
    %27 = tpu.matmul %25, %26, %cst_20 {dimension_numbers = #tpu.dot_dimension_numbers<[1], [0], [0], [1], [0, 0, 1, 1], [], []>} : vector<16x256xbf16>, vector<256x128xbf16>, vector<16x128xf32> -> vector<16x128xf32>
    %c0_21 = arith.constant 0 : index
    %c0_22 = arith.constant 0 : index
    %28 = vector.load %arg9[%c0_21, %c0_22] : memref<1x128xf32, #tpu.memory_space<vmem>>, vector<1x128xf32>
    %29 = vector.broadcast %28 : vector<1x128xf32> to vector<16x128xf32>
    %30 = arith.addf %27, %29 : vector<16x128xf32>
    %cst_23 = arith.constant 0.000000e+00 : f32
    %31 = vector.broadcast %cst_23 : f32 to vector<16x128xf32>
    %32 = arith.maximumf %30, %31 : vector<16x128xf32>
    %c0_24 = arith.constant 0 : index
    %c0_25 = arith.constant 0 : index
    %33 = vector.load %arg10[%c0_24, %c0_25] : memref<16x128xf32, #tpu.memory_space<vmem>>, vector<16x128xf32>
    tpu.vector_store %arg10[%c0_24, %c0_25], %32 {strides = array<i32>} : memref<16x128xf32, #tpu.memory_space<vmem>>, vector<16x128xf32>,
    return
  }
  func.func @transform_0(%arg0: i32) -> (i32, i32) {
    %c0_i32 = arith.constant 0 : i32
    %c0_i32_0 = arith.constant 0 : i32
    return %arg0, %c0_i32 : i32, i32
  }
  func.func @transform_1(%arg0: i32) -> (i32, i32) {
    %c0_i32 = arith.constant 0 : i32
    %c0_i32_0 = arith.constant 0 : i32
    %c0_i32_1 = arith.constant 0 : i32
    return %c0_i32, %c0_i32_0 : i32, i32
  }
  func.func @transform_2(%arg0: i32) -> (i32, i32) {
    %c0_i32 = arith.constant 0 : i32
    %c0_i32_0 = arith.constant 0 : i32
    %c0_i32_1 = arith.constant 0 : i32
    return %c0_i32, %c0_i32_0 : i32, i32
  }
  func.func @transform_3(%arg0: i32) -> (i32, i32) {
    %c0_i32 = arith.constant 0 : i32
    %c0_i32_0 = arith.constant 0 : i32
    %c0_i32_1 = arith.constant 0 : i32
    return %c0_i32, %c0_i32_0 : i32, i32
  }
  func.func @transform_4(%arg0: i32) -> (i32, i32) {
    %c0_i32 = arith.constant 0 : i32
    %c0_i32_0 = arith.constant 0 : i32
    %c0_i32_1 = arith.constant 0 : i32
    return %c0_i32, %c0_i32_0 : i32, i32
  }
  func.func @transform_5(%arg0: i32) -> (i32, i32) {
    %c0_i32 = arith.constant 0 : i32
    %c0_i32_0 = arith.constant 0 : i32
    %c0_i32_1 = arith.constant 0 : i32
    return %c0_i32, %c0_i32_0 : i32, i32
  }
  func.func @transform_6(%arg0: i32) -> (i32, i32) {
    %c0_i32 = arith.constant 0 : i32
    %c0_i32_0 = arith.constant 0 : i32
    %c0_i32_1 = arith.constant 0 : i32
    return %c0_i32, %c0_i32_0 : i32, i32
  }
  func.func @transform_7(%arg0: i32) -> (i32, i32) {
    %c0_i32 = arith.constant 0 : i32
    %c0_i32_0 = arith.constant 0 : i32
    %c0_i32_1 = arith.constant 0 : i32
    return %c0_i32, %c0_i32_0 : i32, i32
  }
  func.func @transform_8(%arg0: i32) -> (i32, i32) {
    %c0_i32 = arith.constant 0 : i32
    %c0_i32_0 = arith.constant 0 : i32
    %c0_i32_1 = arith.constant 0 : i32
    return %c0_i32, %c0_i32_0 : i32, i32
  }
  func.func @transform_9(%arg0: i32) -> (i32, i32) {
    %c0_i32 = arith.constant 0 : i32
    %c0_i32_0 = arith.constant 0 : i32
    return %arg0, %c0_i32 : i32, i32
  }
}

</mosaic_0001>

<bundles_post_ra>
// kernel: tpu_custom_call.1
= control target key start
LH: loop header
LB: loop body
LE: loop exit
PB: predicated region body
PF: predicated region fallthrough
CT: control target
= control target key end

     0   :  { %s2039_s0 = inlined_call_operand.hbm [shape: f32[32,128], index: 0, kind: input, shape index: {}]   ;;  %s2040_s1 = inlined_call_operand.hbm [shape: bf16[128,256], index: 1, kind: input, shape index: {}]   ;;  %s2041_s2 = inlined_call_operand.vmem [shape: f32[1,256], index: 2, kind: input, shape index: {}]   ;;  %s2042_s3 = inlined_call_operand.hbm [shape: bf16[256,128], index: 3, kind: input, shape index: {}]   ;;  %s2043_s4 = inlined_call_operand.vmem [shape: f32[1,128], index: 4, kind: input, shape index: {}]   ;;  %s2044_s5 = inlined_call_operand.hbm [shape: bf16[128,256], index: 5, kind: input, shape index: {}]   ;;  %s2045_s6 = inlined_call_operand.vmem [shape: f32[1,256], index: 6, kind: input, shape index: {}]   ;;  %s2046_s7 = inlined_call_operand.hbm [shape: bf16[256,128], index: 7, kind: input, shape index: {}]   ;;  %s2047_s8 = inlined_call_operand.vmem [shape: f32[1,128], index: 8, kind: input, shape index: {}]   ;;  %s2048_s9 = inlined_call_operand.hbm [shape: f32[32,128], index: 9, kind: output, shape index: {}]  }
   0x1   :  { %2055 = sst [smem:[#allocation16_spill]] %s2040_s1 }
   0x2   :  { %2056 = sst [smem:[#allocation17_spill]] %s2042_s3 }
   0x3   :  { %2057 = sst [smem:[#allocation18_spill]] %s2044_s5 }
   0x4   :  { %14 = vsyncpa [#allocation3], 0 }
   0x5   :  { %16 = vsyncpa [#allocation3 + $0x1], 0 }
   0x6   :  { %17 = vsyncpa [#allocation6], 0 }
   0x7   :  { %18 = vsyncpa [#allocation9], 0 }
   0x8   :  { %19 = vsyncpa [#allocation4], 0 }
   0x9   :  { %21 = vsyncpa [#allocation4 + $0x1], 0  ;;  %s1790_s30 = smov 0   ;;  %s1792_s10 = smov 0  }
   0xa   :  { %s1794_s11 = smov 0   ;;  %s1796_s12 = smov 0  }
   0xb LB: > { %s1811_s13 = sadd.s32 4294967295, %s1725_s12   ;;  %s1213_s14 = sadd.s32 4294967294, %s1725_s12   ;;  %s1725_s12 = sphi %s1796_s12, %s2081_s12   ;;  %s1721_s11 = sphi %s1794_s11, %s2080_s11   ;;  %s1717_s10 = sphi %s1792_s10, %s2079_s10   ;;  %s1713_s30 = sphi %s1790_s30, %s2078_s30  }
   0xc   : > { %p47_p0 = scmp.ne.s32.totalorder %s1717_s10, %s1713_s30  ;;  %p2049_p1 = scmp.eq.s32.totalorder %s1811_s13, 0 }
   0xd   : > { %p239_p2 = scmp.eq.s32.totalorder %s1811_s13, 1  ;;  %p245_p3 = scmp.eq.s32.totalorder %s1213_s14, 1 }
   0xe   : > { %p1820_p4 = por %p2049_p1, %p47_p0  ;;  %p1214_p5 = scmp.ge.s32.totalorder %s1725_s12, 1 }
   0xf   : > { %p1825_p6 = por %p245_p3, %p47_p0  ;;  %p252_p7 = scmp.lt.s32.totalorder %s1725_s12, 3 }
  0x10   : > { %s2058_s15 = scalar_select %p1820_p4, 1, 0 }
  0x11   : > { %s2059_s16 = scalar_select %p1825_p6, 1, 0 }
  0x12   : > { %p1830_p8 = pnand %p1214_p5, %p252_p7  ;;  %s1727_s18 = smov [#allocation5]  }
  0x13   : > { %s264_s19 = sshll.u32 %s1727_s18, 4  ;;  %s1728_s21 = smov [#allocation8]   ;;  %s265_s19 = int_to_ptr.vmem [resolvable:$true] %s264_s19 }
  0x14   : > { %s2060_s17 = scalar_select %p1830_p8, 1, 0 }
  0x15   : > { %p1367_p9 = pneg %p1830_p8  ;;  %s296_s22 = sshll.u32 %s1728_s21, 4  ;;  %s297_s22 = int_to_ptr.vmem [resolvable:$true] %s296_s22 }
  0x16   : > { %s1729_s23 = smov [#allocation7]   ;;  %s1532_s25 = scalar_lea.vmem %s265_s19, 2048 }
  0x17   : > { %p1839_p11 = pnand %p1367_p9, %p2049_p1  ;;  %s280_s24 = sshll.u32 %s1729_s23, 4  ;;  %s281_s24 = int_to_ptr.vmem [resolvable:$true] %s280_s24 }
  0x18   : > { %p1533_p13 = scmp.ne.s32.totalorder %s265_s19, %s1532_s25  ;;  %p1540_p5 = scmp.lt.s32.totalorder %s265_s19, %s265_s19 }
  0x19   : > { %p1523_p12 = pneg %p1839_p11  ;;  %p1541_p7 = scmp.lt.s32.totalorder %s1532_s25, %s1532_s25 }
  0x1b   : > { %p1535_p0 = pnand %p1533_p13, %p1523_p12  ;;  %p1542_p9 = por %p1541_p7, %p1540_p5 }
  0x1d   : > { %p1536_p3 = pneg %p1535_p0 }
  0x1f   : > { %p1543_p10 = pnand %p1542_p9, %p1536_p3 }
  0x21   : > { %1546 = shalt.err (!%p1543_p10)
}
  0x22   : > { %s2050_s26 = smov 128   ;;  %s2051_s27 = smov 8  }
  0x23   : > { %s2062_s1 = sld [smem:[#allocation16_spill]]  ;;  %s1558_s14 = scalar_lea.vmem %s297_s22, 2048 }
  0x24   : > { %p1559_p13 = scmp.ne.s32.totalorder %s297_s22, %s1558_s14  ;;  %p1566_p3 = scmp.lt.s32.totalorder %s297_s22, %s297_s22 }
  0x25   : > { %p1567_p10 = scmp.lt.s32.totalorder %s1558_s14, %s1558_s14 }
  0x26   : > { %p1561_p0 = pnand %p1559_p13, %p1523_p12 }
  0x27   : > { %p1568_p7 = por %p1567_p10, %p1566_p3 }
  0x28   : > { %p1562_p5 = pneg %p1561_p0 }
  0x29   : > { %1370 = dma.hbm_to_vmem [thread:$0]  (!%p1839_p11), %s2062_s1, 2048, %s265_s19, [#allocation6], %s2050_s26, %s2050_s26, %s2051_s27  }
  0x2a   : > { %p1569_p9 = pnand %p1568_p7, %p1562_p5 }
  0x2c   : > { %1572 = shalt.err (!%p1569_p9)
}
  0x2d   : > { %s2063_s5 = sld [smem:[#allocation18_spill]]  ;;  %s1584_s19 = scalar_lea.vmem %s281_s24, 2048 }
  0x2e   : > { %p1585_p1 = scmp.ne.s32.totalorder %s281_s24, %s1584_s19  ;;  %p1592_p3 = scmp.lt.s32.totalorder %s281_s24, %s281_s24 }
  0x2f   : > { %p1593_p5 = scmp.lt.s32.totalorder %s1584_s19, %s1584_s19 }
  0x30   : > { %p1587_p13 = pnand %p1585_p1, %p1523_p12 }
  0x31   : > { %p1594_p10 = por %p1593_p5, %p1592_p3 }
  0x32   : > { %p1588_p0 = pneg %p1587_p13 }
  0x33   : > { %1376 = dma.hbm_to_vmem [thread:$0]  (!%p1839_p11), %s2063_s5, 2048, %s297_s22, [#allocation9], %s2050_s26, %s2050_s26, %s2051_s27  }
  0x34   : > { %p1595_p7 = pnand %p1594_p10, %p1588_p0 }
  0x36   : > { %1598 = shalt.err (!%p1595_p7)
}
  0x37   : > { %s1732_s23 = smov 64   ;;  %s1733_s25 = smov 4  }
  0x38   : > { %s2064_s3 = sld [smem:[#allocation17_spill]]  ;;  %s1734_s22 = smov [#allocation10]  }
  0x39   : > { %s312_s14 = sshll.u32 %s1734_s22, 4  ;;  %s313_s14 = int_to_ptr.vmem [resolvable:$true] %s312_s14 }
  0x3a   : > { %s1610_s18 = scalar_lea.vmem %s313_s14, 2048  ;;  %p1618_p0 = scmp.lt.s32.totalorder %s313_s14, %s313_s14 }
  0x3b   : > { %p1611_p1 = scmp.ne.s32.totalorder %s313_s14, %s1610_s18  ;;  %p1619_p3 = scmp.lt.s32.totalorder %s1610_s18, %s1610_s18 }
  0x3d   : > { %p1613_p9 = pnand %p1611_p1, %p1523_p12  ;;  %p1620_p5 = por %p1619_p3, %p1618_p0 }
  0x3e   : > { %1373 = dma.hbm_to_vmem [thread:$0]  (!%p1839_p11), %s2064_s3, 2048, %s281_s24, [#allocation6], %s1732_s23, %s1732_s23, %s1733_s25  }
  0x3f   : > { %p1614_p13 = pneg %p1613_p9 }
  0x41   : > { %p1621_p10 = pnand %p1620_p5, %p1614_p13 }
  0x43   : > { %1624 = shalt.err (!%p1621_p10)
}
  0x44   : > { %1379 = dma.hbm_to_vmem [thread:$0]  (!%p1839_p11), %s2046_s7, 2048, %s313_s14, [#allocation9], %s1732_s23, %s1732_s23, %s1733_s25  }
  0x45   : > { %s1884_s24 = sadd.s32 1, %s1725_s12   ;;  %s34_s28 = sadd.s32 1, %s1721_s11 }
  0x46   : > { %s31_s20 = ssub.s32 %s1725_s12, %s1884_s24  ;;  %p41_p12 = scmp.ne.s32.totalorder %s1721_s11, %s1717_s10 }
  0x47   : > { %p32_p7 = scmp.eq.s32.totalorder %s31_s20, 0  ;;  %p42_p1 = scmp.eq.s32.totalorder %s1725_s12, 0 }
  0x48   : > { %p1894_p9 = por %p239_p2, %p41_p12  ;;  %p1392_p13 = scmp.lt.s32.totalorder %s1725_s12, 2 }
  0x49   : > { %s1900_s22 = scalar_select %p32_p7, %s1721_s11, %s34_s28  }
  0x4a   : > { %s2065_s29 = scalar_select %p1894_p9, 1, 0 }
  0x4b   : > { %p43_p0 = por %p42_p1, %p41_p12  ;;  %s329_s18 = sand.u32 1, %s1721_s11  }
  0x4c   : > { %s1220_s21 = sshll.u32 %s329_s18, 4  ;;  %s1301_s23 = sshll.u32 %s1725_s12, 8 }
  0x4d   : > { %s1907_s19 = scalar_lea.hbm %s2039_s0, %s1301_s23  ;;  %s333_s20 = scalar_lea.vmem [#allocation2], %s1220_s21 }
  0x4e   : > { %s340_s26 = sshll.u32 %s333_s20, 4  ;;  %p1911_p2 = pnand %p1392_p13, %p43_p0  ;;  %s1909_s26 = int_to_ptr.vmem [resolvable:$true] %s340_s26 }
  0x4f   : > { %s1915_s28 = scalar_lea.sflag [#allocation3], %s329_s18  ;;  %s1625_s1 = scalar_lea.hbm %s1907_s19, 256 }
  0x50   : > { %p1626_p11 = scmp.ne.s32.totalorder %s1907_s19, %s1625_s1  ;;  %p1627_p3 = pneg %p1911_p2 }
  0x51   : > { %s1630_s21 = scalar_lea.hbm %s2039_s0, 512  ;;  %p1631_p12 = scmp.lt.s32.totalorder %s1907_s19, %s2039_s0 }
  0x52   : > { %p1628_p5 = pnand %p1627_p3, %p1626_p11  ;;  %p1632_p7 = scmp.lt.s32.totalorder %s1630_s21, %s1625_s1 }
  0x54   : > { %p1629_p10 = pneg %p1628_p5  ;;  %p1633_p1 = por %p1632_p7, %p1631_p12 }
  0x56   : > { %p1634_p13 = pnand %p1633_p1, %p1629_p10 }
  0x58   : > { %1637 = shalt.err (!%p1634_p13)
}
  0x59   : > { %s1638_s18 = scalar_lea.vmem %s1909_s26, 256  ;;  %s1735_s3 = smov [#allocation2]  }
  0x5a   : > { %p1639_p0 = scmp.ne.s32.totalorder %s1909_s26, %s1638_s18  ;;  %s1643_s5 = sshll.u32 %s1735_s3, 4  ;;  %s1644_s5 = int_to_ptr.vmem [resolvable:$false] %s1643_s5 }
  0x5b   : > { %s1645_s23 = scalar_lea.vmem %s1644_s5, 512  ;;  %p1646_p5 = scmp.lt.s32.totalorder %s1909_s26, %s1644_s5 }
  0x5c   : > { %p1641_p6 = pnand %p1639_p0, %p1627_p3  ;;  %p1647_p9 = scmp.lt.s32.totalorder %s1645_s23, %s1638_s18 }
  0x5e   : > { %p1642_p11 = pneg %p1641_p6  ;;  %p1648_p4 = por %p1647_p9, %p1646_p5 }
  0x60   : > { %p1649_p8 = pnand %p1648_p4, %p1642_p11 }
  0x62   : > { %1652 = shalt.err (!%p1649_p8)
}
  0x63   : > { %s2067_s1 = smov 8   ;;  %s2068_s25 = smov 128  }
  0x64   : > { %1383 = dma.hbm_to_vmem [thread:$0]  (!%p1911_p2), %s1907_s19, 256, %s1909_s26, %s1915_s28, %s2068_s25, %s2068_s25, %s2067_s1  }
  0x65   : > { %p2069_p6 = scmp.ne.s32.totalorder %s2060_s17, 0 }
  0x66   : > { %s1942_s3 = sand.u32 (!%p2069_p6), 1, %s1717_s10   ;;  %p2070_p4 = scmp.ne.s32.totalorder (!%p2069_p6), %s2058_s15, 0 }
  0x67   : > { %352 = sbr.rel (%p2069_p6) target bundleno = 986 (0x3da), region = 56  ;;  %s1224_s5 = sshll.u32 (!%p2069_p6), %s1942_s3, 4 }
  0x68   : > { %s355_s21 = scalar_lea.sflag (!%p2069_p6), [#allocation3], %s1942_s3  ;;  %s1948_s27 = scalar_lea.vmem (!%p2069_p6), [#allocation2], %s1224_s5 }
  0x6c   : > { %1696 = dma.done.wait (%p2070_p4), %s355_s21, 256  }
  0x6d   : > { %1698 = vsyncadd (%p2070_p4), %s355_s21, 4294967040  ;;  %p2071_p8 = scmp.eq.s32.totalorder %s1811_s13, 0 }
  0x6f   : > { %1700 = dma.done.wait (%p2071_p8), [#allocation6], 4096   ;;  %p2072_p9 = pmov %p2071_p8 }
  0x70   : > { %p2073_p2 = pmov %p2071_p8 }
  0x71   : > { %1702 = vsyncadd (%p2072_p9), [#allocation6], 4294963200 }
  0x72   : > { %1704 = dma.done.wait (%p2073_p2), [#allocation9], 4096   ;;  %p2074_p3 = pmov %p2073_p2 }
  0x73   : > { %v1736_v0 = vmov 0   ;;  %v1441_v1 = vld [vmem:[#allocation5 + $0x74] ss:$8 sps:$4 sm:$0xff]   ;;  %v1443_v2 = vld [vmem:[#allocation5 + $0x70] ss:$8 sps:$4 sm:$0xff]   ;;  %v1469_v16 = vld [vmem:[#allocation7 + $0x68] sm:$0xff]   ;;  %v433_v46 = vlaneseq }
  0x74   : > { %1706 = vsyncadd (%p2074_p3), [#allocation9], 4294963200  ;;  %555 = vmatprep.mubr.bf16.mxu0 %v1736_v0  ;;  %523 = vmatprep.subr.bf16.mxu0 %v1441_v1  ;;  %v1444_v3 = vld [vmem:[#allocation5 + $0x64] ss:$8 sps:$4 sm:$0xff]   ;;  %v1446_v4 = vld [vmem:[#allocation5 + $0x60] ss:$8 sps:$4 sm:$0xff]  }
  0x75   : > { %524 = vmatpush1.bf16.msra.mxu0 %v1443_v2  ;;  %v1447_v5 = vld [vmem:[#allocation5 + $0x54] ss:$8 sps:$4 sm:$0xff]   ;;  %v1449_v6 = vld [vmem:[#allocation5 + $0x50] ss:$8 sps:$4 sm:$0xff]   ;;  %v1450_v7 = vld [vmem:[#allocation5 + $0x44] ss:$8 sps:$4 sm:$0xff]  }
  0x76   : > { %525 = vmatprep.subr.bf16.mxu0 %v1444_v3  ;;  %v1452_v8 = vld [vmem:[#allocation5 + $0x40] ss:$8 sps:$4 sm:$0xff]   ;;  %v1453_v9 = vld [vmem:[#allocation5 + $0x34] ss:$8 sps:$4 sm:$0xff]   ;;  %v1455_v11 = vld [vmem:[#allocation5 + $0x30] ss:$8 sps:$4 sm:$0xff]  }
  0x77   : > { %v1465_v10 = vld [vmem:[#allocation7 + $0x78] sm:$0xff]   ;;  %v1456_v13 = vld [vmem:[#allocation5 + $0x24] ss:$8 sps:$4 sm:$0xff]   ;;  %v1467_v14 = vld [vmem:[#allocation7 + $0x70] sm:$0xff]   ;;  %v1964_v47 = vshrl.u32 %v433_v46, 7  ;;  %s408_s23 = scalar_lea.vmem [#allocation11], %s1224_s5 }
  0x78   : > { %v1466_v12 = vld [vmem:[#allocation7 + $0x38] sm:$0xff]   ;;  %1303 = vmatprep.subr.bf16.mxu1 %v1465_v10  ;;  %v1468_v15 = vld [vmem:[#allocation7 + $0x30] sm:$0xff]   ;;  %v1458_v17 = vld [vmem:[#allocation5 + $0x20] ss:$8 sps:$4 sm:$0xff]   ;;  %s1102_s1 = sshll.u32 %s408_s23, 4  ;;  %s1302_s25 = sshll.u32 %s1811_s13, 8  ;;  %s1991_s1 = int_to_ptr.vmem [resolvable:$true] %s1102_s1 }
  0x79   : > { %526 = vmatpush1.bf16.msra.mxu0 %v1446_v4  ;;  %1304 = vmatpush3.bf16.msra.mxu1 %v1466_v12  ;;  %v1459_v18 = vld [vmem:[#allocation5 + $0x14] ss:$8 sps:$4 sm:$0xff]   ;;  %v1470_v19 = vld [vmem:[#allocation7 + $0x28] sm:$0xff]   ;;  %v1471_v20 = vld [vmem:[#allocation7 + $0x60] sm:$0xff]   ;;  %v439_v48 = vsub.s32 1, %v1964_v47  ;;  %v435_v49 = vsub.s32 0, %v1964_v47  ;;  %s1996_s15 = scalar_lea.hbm %s2048_s9, %s1302_s25 }
  0x7a   : > { %527 = vmatprep.subr.bf16.mxu0 %v1447_v5  ;;  %1305 = vmatprep.subr.bf16.mxu1 %v1467_v14  ;;  %v1461_v21 = vld [vmem:[#allocation5 + $0x10] ss:$8 sps:$4 sm:$0xff]   ;;  %v1472_v22 = vld [vmem:[#allocation7 + $0x20] sm:$0xff]   ;;  %v1477_v32 = vld [vmem:[#allocation7 + $0x48] sm:$0xff]   ;;  %s1089_s5 = scalar_lea.sflag [#allocation4], %s1942_s3  ;;  %s1653_s17 = scalar_lea.vmem %s1991_s1, 256 }
  0x7b   : > { %v1462_v23 = vld [vmem:[#allocation5 + $0x4] ss:$8 sps:$4 sm:$0xff]   ;;  %v1473_v24 = vld [vmem:[#allocation7 + $0x58] sm:$0xff]   ;;  %v1464_v25 = vld [vmem:[#allocation5] ss:$8 sps:$4 sm:$0xff]   ;;  %p1654_p10 = scmp.ne.s32.totalorder %s1991_s1, %s1653_s17  ;;  %p2075_p12 = scmp.ne.s32.totalorder %s2065_s29, 0 }
  0x7c   : > { %v412_v26 = vld [vmem:[%s1948_s27] sm:$0xff]  ;;  %v413_v27 = vld [vmem:[%s1948_s27 + $0x8] sm:$0xff]  ;;  %s1737_s13 = smov [#allocation11]  }
  0x7d   : > { %528 = vmatpush1.bf16.msra.mxu0 %v1449_v6  ;;  %1306 = vmatpush3.bf16.msra.mxu1 %v1468_v15  ;;  %v1474_v28 = vld [vmem:[#allocation7 + $0x18] sm:$0xff]   ;;  %v414_v29 = vpack.c.bf16 %v413_v27, %v412_v26  ;;  %v1475_v30 = vld [vmem:[#allocation7 + $0x50] sm:$0xff]   ;;  %v1478_v33 = vld [vmem:[#allocation7 + $0x8] sm:$0xff]   ;;  %p1655_p7 = pnand %p1654_p10, %p2075_p12  ;;  %s1657_s26 = sshll.u32 %s1737_s13, 4  ;;  %s1658_s26 = int_to_ptr.vmem [resolvable:$false] %s1657_s26 }
  0x7e   : > { %529 = vmatprep.subr.bf16.mxu0 %v1450_v7  ;;  %1307 = vmatprep.subr.bf16.mxu1 %v1469_v16  ;;  %v1476_v31 = vld [vmem:[#allocation7 + $0x10] sm:$0xff]   ;;  %v1479_v34 = vld [vmem:[#allocation7 + $0x40] sm:$0xff]   ;;  %v1506_v10 = vld [vmem:[#allocation10 + $0x38] sm:$0xff]   ;;  %s1659_s19 = scalar_lea.vmem %s1658_s26, 512  ;;  %p1660_p13 = scmp.lt.s32.totalorder %s1991_s1, %s1658_s26 }
  0x7f   : > { %v1480_v35 = vld [vmem:[#allocation7] sm:$0xff]   ;;  %v1481_v36 = vld [vmem:[#allocation8 + $0x70] ss:$8 sps:$4 sm:$0xff]   ;;  %v1483_v37 = vld [vmem:[#allocation8 + $0x74] ss:$8 sps:$4 sm:$0xff]   ;;  %p1656_p1 = pneg %p1655_p7  ;;  %p1661_p0 = scmp.lt.s32.totalorder %s1659_s19, %s1653_s17 }
  0x80   : > { %v1486_v38 = vld [vmem:[#allocation8 + $0x64] ss:$8 sps:$4 sm:$0xff]   ;;  %v1484_v39 = vld [vmem:[#allocation8 + $0x60] ss:$8 sps:$4 sm:$0xff]   ;;  %v1489_v40 = vld [vmem:[#allocation8 + $0x54] ss:$8 sps:$4 sm:$0xff]  }
  0x81   : > { %530 = vmatpush1.bf16.msra.mxu0 %v1452_v8  ;;  %1308 = vmatpush3.bf16.msra.mxu1 %v1470_v19  ;;  %v1487_v41 = vld [vmem:[#allocation8 + $0x50] ss:$8 sps:$4 sm:$0xff]   ;;  %v1492_v42 = vld [vmem:[#allocation8 + $0x44] ss:$8 sps:$4 sm:$0xff]   ;;  %v1490_v43 = vld [vmem:[#allocation8 + $0x40] ss:$8 sps:$4 sm:$0xff]   ;;  %p1662_p11 = por %p1661_p0, %p1660_p13 }
  0x82   : > { %531 = vmatprep.subr.bf16.mxu0 %v1453_v9  ;;  %1309 = vmatprep.subr.bf16.mxu1 %v1471_v20  ;;  %v1495_v44 = vld [vmem:[#allocation8 + $0x34] ss:$8 sps:$4 sm:$0xff]   ;;  %v1493_v45 = vld [vmem:[#allocation8 + $0x30] ss:$8 sps:$4 sm:$0xff]   ;;  %v431_v50 = vld [vmem:[%s2041_s2] sm:$0x3] }
  0x83   : > { %v440_v52 = vrot.slane %v431_v50, %v439_v48  ;;  %v436_v53 = vrot.slane %v431_v50, %v435_v49  ;;  %v1498_v3 = vld [vmem:[#allocation8 + $0x24] ss:$8 sps:$4 sm:$0xff]   ;;  %v1496_v4 = vld [vmem:[#allocation8 + $0x20] ss:$8 sps:$4 sm:$0xff]   ;;  %v1501_v5 = vld [vmem:[#allocation8 + $0x14] ss:$8 sps:$4 sm:$0xff]   ;;  %p1663_p5 = pnand %p1662_p11, %p1656_p1 }
  0x84   : > { %v1499_v6 = vld [vmem:[#allocation8 + $0x10] ss:$8 sps:$4 sm:$0xff]   ;;  %v1504_v7 = vld [vmem:[#allocation8 + $0x4] ss:$8 sps:$4 sm:$0xff]   ;;  %v1502_v8 = vld [vmem:[#allocation8] ss:$8 sps:$4 sm:$0xff]  }
  0x85   : > { %532 = vmatpush1.bf16.msra.mxu0 %v1455_v11  ;;  %1310 = vmatpush3.bf16.msra.mxu1 %v1472_v22  ;;  %v1505_v9 = vld [vmem:[#allocation10 + $0x78] sm:$0xff]   ;;  %v1507_v11 = vld [vmem:[#allocation10 + $0x70] sm:$0xff]   ;;  %v1510_v14 = vld [vmem:[#allocation10 + $0x28] sm:$0xff]  }
  0x86   : > { %533 = vmatprep.subr.bf16.mxu0 %v1456_v13  ;;  %1311 = vmatprep.subr.bf16.mxu1 %v1473_v24  ;;  %v1508_v12 = vld [vmem:[#allocation10 + $0x30] sm:$0xff]   ;;  %v1509_v13 = vld [vmem:[#allocation10 + $0x68] sm:$0xff]   ;;  %v1511_v15 = vld [vmem:[#allocation10 + $0x60] sm:$0xff]  }
  0x87   : > { %v1512_v16 = vld [vmem:[#allocation10 + $0x20] sm:$0xff]  }
  0x88   : > { %v1246_v22 = vld [vmem:[%s2043_s4] ss:$0 sm:$0xff] }
  0x89   : > { %534 = vmatpush1.bf16.msra.mxu0 %v1458_v17  ;;  %1312 = vmatpush3.bf16.msra.mxu1 %v1474_v28  ;;  %v1513_v17 = vld [vmem:[#allocation10 + $0x58] sm:$0xff]   ;;  %v1279_v47 = vld [vmem:[%s2047_s8] ss:$0 sm:$0xff] }
  0x8a   : > { %535 = vmatprep.subr.bf16.mxu0 %v1459_v18  ;;  %1313 = vmatprep.subr.bf16.mxu1 %v1475_v30  ;;  %v1514_v18 = vld [vmem:[#allocation10 + $0x18] sm:$0xff]  }
  0x8d   : > { %536 = vmatpush1.bf16.msra.mxu0 %v1461_v21  ;;  %1314 = vmatpush3.bf16.msra.mxu1 %v1476_v31  ;;  %v1515_v31 = vld [vmem:[#allocation10 + $0x50] sm:$0xff]  }
  0x8e   : > { %537 = vmatprep.subr.bf16.mxu0 %v1462_v23  ;;  %1315 = vmatprep.subr.bf16.mxu1 %v1477_v32  ;;  %v1516_v32 = vld [vmem:[#allocation10 + $0x10] sm:$0xff]  }
  0x91   : > { %538 = vmatpush1.bf16.msra.mxu0 %v1464_v25  ;;  %1316 = vmatpush3.bf16.msra.mxu1 %v1478_v33  ;;  %v1517_v33 = vld [vmem:[#allocation10 + $0x48] sm:$0xff]  }
  0x92   : > { %1317 = vmatprep.subr.bf16.mxu1 %v1479_v34  ;;  %859 = vmatprep.subr.bf16.mxu0 %v1483_v37  ;;  %v1518_v34 = vld [vmem:[#allocation10 + $0x8] sm:$0xff]   ;;  %v767_v37 = vld [vmem:[%s2045_s6] sm:$0x3] }
  0x94   : > { %556 = vmatmul.mubr.bf16.vlgmr.msra.gmra.mxu0 %v414_v29 }
  0x95   : > { %891 = vmatprep.mubr.bf16.mxu0 %v1736_v0  ;;  %1318 = vmatpush3.bf16.msra.mxu1 %v1480_v35  ;;  %v1519_v35 = vld [vmem:[#allocation10 + $0x40] sm:$0xff]  }
  0x96   : > { %860 = vmatpush1.bf16.msra.mxu0 %v1481_v36  ;;  %1325 = vmatprep.subr.bf16.mxu1 %v1505_v9  ;;  %v1520_v36 = vld [vmem:[#allocation10] sm:$0xff]  }
  0x97   : > { %861 = vmatprep.subr.bf16.mxu0 %v1486_v38 }
  0x9a   : > { %862 = vmatpush1.bf16.msra.mxu0 %v1484_v39  ;;  %v776_v39 = vrot.slane %v767_v37, %v439_v48 }
  0x9b   : > { %863 = vmatprep.subr.bf16.mxu0 %v1489_v40  ;;  %v772_v40 = vrot.slane %v767_v37, %v435_v49 }
  0x9e   : > { %864 = vmatpush1.bf16.msra.mxu0 %v1487_v41 }
  0x9f   : > { %865 = vmatprep.subr.bf16.mxu0 %v1492_v42 }
  0xa2   : > { %866 = vmatpush1.bf16.msra.mxu0 %v1490_v43 }
  0xa3   : > { %867 = vmatprep.subr.bf16.mxu0 %v1495_v44 }
  0xa6   : > { %868 = vmatpush1.bf16.msra.mxu0 %v1493_v45 }
  0xa7   : > { %869 = vmatprep.subr.bf16.mxu0 %v1498_v3 }
  0xaa   : > { %870 = vmatpush1.bf16.msra.mxu0 %v1496_v4 }
  0xab   : > { %871 = vmatprep.subr.bf16.mxu0 %v1501_v5 }
  0xae   : > { %872 = vmatpush1.bf16.msra.mxu0 %v1499_v6 }
  0xaf   : > { %873 = vmatprep.subr.bf16.mxu0 %v1504_v7 }
  0xb2   : > { %874 = vmatpush1.bf16.msra.mxu0 %v1502_v8 }
 0x154   : > { %v557_v51 = vpop.f32.mrf.mxu0 }
 0x155   : > { %v558_v58 = vadd.f32 %v557_v51, %v436_v53 }
 0x156   : > { %v559_v54 = vpop.f32.mrf.mxu0 }
 0x157   : > { %v560_v56 = vadd.f32 %v559_v54, %v440_v52  ;;  %v566_v0 = vmax.f32 %v558_v58, 0.0 }
 0x158   : > { %v561_v55 = vpop.f32.mrf.mxu0 }
 0x159   : > { %v562_v57 = vadd.f32 %v561_v55, %v436_v53  ;;  %v567_v62 = vmax.f32 %v560_v56, 0.0 }
 0x15a   : > { %v563_v59 = vpop.f32.mrf.mxu0 }
 0x15b   : > { %v564_v60 = vadd.f32 %v563_v59, %v440_v52  ;;  %v568_v61 = vmax.f32 %v562_v57, 0.0 }
 0x15d   : > { %v569_v63 = vmax.f32 %v564_v60, 0.0  ;;  %v570_v2 = vpack.c.bf16 %v568_v61, %v566_v0 }
 0x15f   : > { %v571_v1 = vpack.c.bf16 %v569_v63, %v567_v62 }
 0x161   : > { %739 = vmatprep.mubr.bf16.mxu1 %v571_v1 }
 0x162   : > { %740 = vmatmul.mubr.bf16.vlgmr.msra.gmra.mxu1 %v570_v2 }
 0x163   : > { %1326 = vmatpush3.bf16.msra.mxu1 %v1506_v10 }
 0x164   : > { %1327 = vmatprep.subr.bf16.mxu1 %v1507_v11 }
 0x167   : > { %1328 = vmatpush3.bf16.msra.mxu1 %v1508_v12 }
 0x168   : > { %1329 = vmatprep.subr.bf16.mxu1 %v1509_v13 }
 0x16b   : > { %1330 = vmatpush3.bf16.msra.mxu1 %v1510_v14 }
 0x16c   : > { %1331 = vmatprep.subr.bf16.mxu1 %v1511_v15 }
 0x16f   : > { %1332 = vmatpush3.bf16.msra.mxu1 %v1512_v16 }
 0x170   : > { %1333 = vmatprep.subr.bf16.mxu1 %v1513_v17 }
 0x173   : > { %1334 = vmatpush3.bf16.msra.mxu1 %v1514_v18 }
 0x174   : > { %1335 = vmatprep.subr.bf16.mxu1 %v1515_v31 }
 0x177   : > { %1336 = vmatpush3.bf16.msra.mxu1 %v1516_v32 }
 0x178   : > { %1337 = vmatprep.subr.bf16.mxu1 %v1517_v33 }
 0x17b   : > { %1338 = vmatpush3.bf16.msra.mxu1 %v1518_v34 }
 0x17c   : > { %1339 = vmatprep.subr.bf16.mxu1 %v1519_v35 }
 0x17f   : > { %1340 = vmatpush3.bf16.msra.mxu1 %v1520_v36 }
 0x222   : > { %v1319_v19 = vpop.f32.mrf.mxu1 }
 0x224   : > { %v1320_v20 = vpop.f32.mrf.mxu1 }
 0x225   : > { %v1321_v21 = vadd.f32 %v1320_v20, %v1319_v19 }
 0x226   : > { %v1322_v23 = vpop.f32.mrf.mxu1 }
 0x227   : > { %v742_v25 = vadd.f32 %v1321_v21, %v1246_v22 }
 0x228   : > { %v1323_v24 = vpop.f32.mrf.mxu1 }
 0x229   : > { %v1324_v26 = vadd.f32 %v1323_v24, %v1322_v23  ;;  %v748_v28 = vmax.f32 %v742_v25, 0.0 }
 0x22b   : > { %v745_v27 = vadd.f32 %v1324_v26, %v1246_v22 }
 0x22d   : > { %v749_v29 = vmax.f32 %v745_v27, 0.0 }
 0x22f   : > { %v750_v30 = vpack.c.bf16 %v749_v29, %v748_v28 }
 0x231   : > { %892 = vmatmul.mubr.bf16.vlgmr.msra.gmra.mxu0 %v750_v30 }
 0x2f1   : > { %v893_v38 = vpop.f32.mrf.mxu0 }
 0x2f2   : > { %v894_v45 = vadd.f32 %v893_v38, %v772_v40 }
 0x2f3   : > { %v895_v41 = vpop.f32.mrf.mxu0 }
 0x2f4   : > { %v896_v43 = vadd.f32 %v895_v41, %v776_v39  ;;  %v902_v54 = vmax.f32 %v894_v45, 0.0 }
 0x2f5   : > { %v897_v42 = vpop.f32.mrf.mxu0 }
 0x2f6   : > { %v898_v44 = vadd.f32 %v897_v42, %v772_v40  ;;  %v903_v52 = vmax.f32 %v896_v43, 0.0 }
 0x2f7   : > { %v899_v46 = vpop.f32.mrf.mxu0 }
 0x2f8   : > { %v900_v50 = vadd.f32 %v899_v46, %v776_v39  ;;  %v904_v51 = vmax.f32 %v898_v44, 0.0 }
 0x2fa   : > { %v905_v53 = vmax.f32 %v900_v50, 0.0  ;;  %v906_v56 = vpack.c.bf16 %v904_v51, %v902_v54 }
 0x2fc   : > { %v907_v55 = vpack.c.bf16 %v905_v53, %v903_v52 }
 0x2fe   : > { %1075 = vmatprep.mubr.bf16.mxu1 %v907_v55 }
 0x2ff   : > { %1076 = vmatmul.mubr.bf16.vlgmr.msra.gmra.mxu1 %v906_v56 }
 0x3bf   : > { %v1341_v48 = vpop.f32.mrf.mxu1 }
 0x3c1   : > { %v1342_v49 = vpop.f32.mrf.mxu1 }
 0x3c2   : > { %v1343_v57 = vadd.f32 %v1342_v49, %v1341_v48 }
 0x3c3   : > { %v1344_v58 = vpop.f32.mrf.mxu1 }
 0x3c4   : > { %v1078_v59 = vadd.f32 %v1343_v57, %v1279_v47 }
 0x3c5   : > { %v1345_v60 = vpop.f32.mrf.mxu1 }
 0x3c6   : > { %v1084_v61 = vmax.f32 %v1078_v59, 0.0  ;;  %v1346_v62 = vadd.f32 %v1345_v60, %v1344_v58 }
 0x3c8   : > { %1086 = vst [vmem:[%s408_s23] sm:$0xff] %v1084_v61  ;;  %v1081_v63 = vadd.f32 %v1346_v62, %v1279_v47 }
 0x3ca   : > { %v1085_v0 = vmax.f32 %v1081_v63, 0.0 }
 0x3cc   : > { %1087 = vst [vmem:[%s408_s23 + $0x8] sm:$0xff] %v1085_v0 }
 0x3cd   : > { %1666 = shalt.err (!%p1663_p5)
}
 0x3ce   : > { %s1667_s28 = scalar_lea.hbm %s1996_s15, 256  ;;  %s1671_s18 = scalar_lea.hbm %s2048_s9, 512 }
 0x3cf   : > { %p1668_p6 = scmp.ne.s32.totalorder %s1996_s15, %s1667_s28  ;;  %p1672_p9 = scmp.lt.s32.totalorder %s1996_s15, %s2048_s9 }
 0x3d0   : > { %p1673_p2 = scmp.lt.s32.totalorder %s1671_s18, %s1667_s28 }
 0x3d1   : > { %p1669_p4 = pnand %p1668_p6, %p2075_p12 }
 0x3d2   : > { %p1674_p3 = por %p1673_p2, %p1672_p9 }
 0x3d3   : > { %p1670_p8 = pneg %p1669_p4 }
 0x3d5   : > { %p1675_p10 = pnand %p1674_p3, %p1670_p8 }
 0x3d7   : > { %1678 = shalt.err (!%p1675_p10)
}
 0x3d8   : > { %s1738_s21 = smov 128   ;;  %s1739_s27 = smov 8  }
 0x3d9   : > { %1365 = dma.vmem_to_hbm [thread:$0]  (%p2075_p12), %s1991_s1, 256, %s1996_s15, %s1089_s5, %s1738_s21, %s1738_s21, %s1739_s27  }
 0x3da PF: > { %s1117_s17 = sand.u32 1, %s1713_s30   ;;  %p2076_p7 = scmp.ne.s32.totalorder %s2059_s16, 0 }
 0x3db   : > { %p2077_p1 = scmp.ge.s32.totalorder %s1725_s12, 2  ;;  %s1118_s13 = scalar_lea.sflag [#allocation4], %s1117_s17 }
 0x3dd   : > { %p1385_p13 = pnand %p2077_p1, %p2076_p7 }
 0x3df   : > { %p1386_p0 = pneg %p1385_p13 }
 0x3e1   : > { %1708 = dma.done.wait (%p1386_p0), %s1118_s13, 256  }
 0x3e2   : > { %1710 = vsyncadd (%p1386_p0), %s1118_s13, 4294967040  ;;  %p24_p11 = scmp.ge.s32.totalorder %s1884_s24, 4   ;;  %s2078_s30 = smov %s1717_s10 }
 0x3e3   : > { %s2079_s10 = smov %s1721_s11  ;;  %s2080_s11 = smov %s1900_s22 }
 0x3e4   : > { %s2081_s12 = smov %s1884_s24  ;;  %26 = sbr.rel (!%p24_p11) target bundleno = 11 (0xb), region = 117 }
 0x3e9   :  { %1123 = vsyncpa [#allocation3], 1 }
 0x3ea   :  { %1125 = vsyncpa [#allocation3 + $0x1], 1 }
 0x3eb   :  { %1126 = vsyncpa [#allocation6], 1 }
 0x3ec   :  { %1127 = vsyncpa [#allocation9], 1 }
 0x3ed   :  { %1128 = vsyncpa [#allocation4], 1 }
 0x3ee   :  { %1130 = vsyncpa [#allocation4 + $0x1], 1 }

// kernel: tpu_custom_call.1
= control target key start
LH: loop header
LB: loop body
LE: loop exit
PB: predicated region body
PF: predicated region fallthrough
CT: control target
= control target key end

     0   :  { %s2039_s0 = inlined_call_operand.hbm [shape: f32[32,128], index: 0, kind: input, shape index: {}]   ;;  %s2040_s1 = inlined_call_operand.hbm [shape: bf16[128,256], index: 1, kind: input, shape index: {}]   ;;  %s2041_s2 = inlined_call_operand.vmem [shape: f32[1,256], index: 2, kind: input, shape index: {}]   ;;  %s2042_s3 = inlined_call_operand.hbm [shape: bf16[256,128], index: 3, kind: input, shape index: {}]   ;;  %s2043_s4 = inlined_call_operand.vmem [shape: f32[1,128], index: 4, kind: input, shape index: {}]   ;;  %s2044_s5 = inlined_call_operand.hbm [shape: bf16[128,256], index: 5, kind: input, shape index: {}]   ;;  %s2045_s6 = inlined_call_operand.vmem [shape: f32[1,256], index: 6, kind: input, shape index: {}]   ;;  %s2046_s7 = inlined_call_operand.hbm [shape: bf16[256,128], index: 7, kind: input, shape index: {}]   ;;  %s2047_s8 = inlined_call_operand.vmem [shape: f32[1,128], index: 8, kind: input, shape index: {}]   ;;  %s2048_s9 = inlined_call_operand.hbm [shape: f32[32,128], index: 9, kind: output, shape index: {}]  }
   0x1   :  { %2055 = sst [smem:[#allocation16_spill]] %s2040_s1 }
   0x2   :  { %2056 = sst [smem:[#allocation17_spill]] %s2042_s3 }
   0x3   :  { %2057 = sst [smem:[#allocation18_spill]] %s2044_s5 }
   0x4   :  { %14 = vsyncpa [#allocation3], 0 }
   0x5   :  { %16 = vsyncpa [#allocation3 + $0x1], 0 }
   0x6   :  { %17 = vsyncpa [#allocation6], 0 }
   0x7   :  { %18 = vsyncpa [#allocation9], 0 }
   0x8   :  { %19 = vsyncpa [#allocation4], 0 }
   0x9   :  { %21 = vsyncpa [#allocation4 + $0x1], 0  ;;  %s1790_s30 = smov 0   ;;  %s1792_s10 = smov 0  }
   0xa   :  { %s1794_s11 = smov 0   ;;  %s1796_s12 = smov 0  }
   0xb LB: > { %s1811_s13 = sadd.s32 4294967295, %s1725_s12   ;;  %s1213_s14 = sadd.s32 4294967294, %s1725_s12   ;;  %s1725_s12 = sphi %s1796_s12, %s2081_s12   ;;  %s1721_s11 = sphi %s1794_s11, %s2080_s11   ;;  %s1717_s10 = sphi %s1792_s10, %s2079_s10   ;;  %s1713_s30 = sphi %s1790_s30, %s2078_s30  }
   0xc   : > { %p47_p0 = scmp.ne.s32.totalorder %s1717_s10, %s1713_s30  ;;  %p2049_p1 = scmp.eq.s32.totalorder %s1811_s13, 0 }
   0xd   : > { %p239_p2 = scmp.eq.s32.totalorder %s1811_s13, 1  ;;  %p245_p3 = scmp.eq.s32.totalorder %s1213_s14, 1 }
   0xe   : > { %p1820_p4 = por %p2049_p1, %p47_p0  ;;  %p1214_p5 = scmp.ge.s32.totalorder %s1725_s12, 1 }
   0xf   : > { %p1825_p6 = por %p245_p3, %p47_p0  ;;  %p252_p7 = scmp.lt.s32.totalorder %s1725_s12, 3 }
  0x10   : > { %s2058_s15 = scalar_select %p1820_p4, 1, 0 }
  0x11   : > { %s2059_s16 = scalar_select %p1825_p6, 1, 0 }
  0x12   : > { %p1830_p8 = pnand %p1214_p5, %p252_p7  ;;  %s1727_s18 = smov [#allocation5]  }
  0x13   : > { %s264_s19 = sshll.u32 %s1727_s18, 4  ;;  %s1728_s21 = smov [#allocation8]   ;;  %s265_s19 = int_to_ptr.vmem [resolvable:$true] %s264_s19 }
  0x14   : > { %s2060_s17 = scalar_select %p1830_p8, 1, 0 }
  0x15   : > { %p1367_p9 = pneg %p1830_p8  ;;  %s296_s22 = sshll.u32 %s1728_s21, 4  ;;  %s297_s22 = int_to_ptr.vmem [resolvable:$true] %s296_s22 }
  0x16   : > { %s1729_s23 = smov [#allocation7]   ;;  %s1532_s25 = scalar_lea.vmem %s265_s19, 2048 }
  0x17   : > { %p1839_p11 = pnand %p1367_p9, %p2049_p1  ;;  %s280_s24 = sshll.u32 %s1729_s23, 4  ;;  %s281_s24 = int_to_ptr.vmem [resolvable:$true] %s280_s24 }
  0x18   : > { %p1533_p13 = scmp.ne.s32.totalorder %s265_s19, %s1532_s25  ;;  %p1540_p5 = scmp.lt.s32.totalorder %s265_s19, %s265_s19 }
  0x19   : > { %p1523_p12 = pneg %p1839_p11  ;;  %p1541_p7 = scmp.lt.s32.totalorder %s1532_s25, %s1532_s25 }
  0x1b   : > { %p1535_p0 = pnand %p1533_p13, %p1523_p12  ;;  %p1542_p9 = por %p1541_p7, %p1540_p5 }
  0x1d   : > { %p1536_p3 = pneg %p1535_p0 }
  0x1f   : > { %p1543_p10 = pnand %p1542_p9, %p1536_p3 }
  0x21   : > { %1546 = shalt.err (!%p1543_p10)
}
  0x22   : > { %s2050_s26 = smov 128   ;;  %s2051_s27 = smov 8  }
  0x23   : > { %s2062_s1 = sld [smem:[#allocation16_spill]]  ;;  %s1558_s14 = scalar_lea.vmem %s297_s22, 2048 }
  0x24   : > { %p1559_p13 = scmp.ne.s32.totalorder %s297_s22, %s1558_s14  ;;  %p1566_p3 = scmp.lt.s32.totalorder %s297_s22, %s297_s22 }
  0x25   : > { %p1567_p10 = scmp.lt.s32.totalorder %s1558_s14, %s1558_s14 }
  0x26   : > { %p1561_p0 = pnand %p1559_p13, %p1523_p12 }
  0x27   : > { %p1568_p7 = por %p1567_p10, %p1566_p3 }
  0x28   : > { %p1562_p5 = pneg %p1561_p0 }
  0x29   : > { %1370 = dma.hbm_to_vmem [thread:$0]  (!%p1839_p11), %s2062_s1, 2048, %s265_s19, [#allocation6], %s2050_s26, %s2050_s26, %s2051_s27  }
  0x2a   : > { %p1569_p9 = pnand %p1568_p7, %p1562_p5 }
  0x2c   : > { %1572 = shalt.err (!%p1569_p9)
}
  0x2d   : > { %s2063_s5 = sld [smem:[#allocation18_spill]]  ;;  %s1584_s19 = scalar_lea.vmem %s281_s24, 2048 }
  0x2e   : > { %p1585_p1 = scmp.ne.s32.totalorder %s281_s24, %s1584_s19  ;;  %p1592_p3 = scmp.lt.s32.totalorder %s281_s24, %s281_s24 }
  0x2f   : > { %p1593_p5 = scmp.lt.s32.totalorder %s1584_s19, %s1584_s19 }
  0x30   : > { %p1587_p13 = pnand %p1585_p1, %p1523_p12 }
  0x31   : > { %p1594_p10 = por %p1593_p5, %p1592_p3 }
  0x32   : > { %p1588_p0 = pneg %p1587_p13 }
  0x33   : > { %1376 = dma.hbm_to_vmem [thread:$0]  (!%p1839_p11), %s2063_s5, 2048, %s297_s22, [#allocation9], %s2050_s26, %s2050_s26, %s2051_s27  }
  0x34   : > { %p1595_p7 = pnand %p1594_p10, %p1588_p0 }
  0x36   : > { %1598 = shalt.err (!%p1595_p7)
}
  0x37   : > { %s1732_s23 = smov 64   ;;  %s1733_s25 = smov 4  }
  0x38   : > { %s2064_s3 = sld [smem:[#allocation17_spill]]  ;;  %s1734_s22 = smov [#allocation10]  }
  0x39   : > { %s312_s14 = sshll.u32 %s1734_s22, 4  ;;  %s313_s14 = int_to_ptr.vmem [resolvable:$true] %s312_s14 }
  0x3a   : > { %s1610_s18 = scalar_lea.vmem %s313_s14, 2048  ;;  %p1618_p0 = scmp.lt.s32.totalorder %s313_s14, %s313_s14 }
  0x3b   : > { %p1611_p1 = scmp.ne.s32.totalorder %s313_s14, %s1610_s18  ;;  %p1619_p3 = scmp.lt.s32.totalorder %s1610_s18, %s1610_s18 }
  0x3d   : > { %p1613_p9 = pnand %p1611_p1, %p1523_p12  ;;  %p1620_p5 = por %p1619_p3, %p1618_p0 }
  0x3e   : > { %1373 = dma.hbm_to_vmem [thread:$0]  (!%p1839_p11), %s2064_s3, 2048, %s281_s24, [#allocation6], %s1732_s23, %s1732_s23, %s1733_s25  }
  0x3f   : > { %p1614_p13 = pneg %p1613_p9 }
  0x41   : > { %p1621_p10 = pnand %p1620_p5, %p1614_p13 }
  0x43   : > { %1624 = shalt.err (!%p1621_p10)
}
  0x44   : > { %1379 = dma.hbm_to_vmem [thread:$0]  (!%p1839_p11), %s2046_s7, 2048, %s313_s14, [#allocation9], %s1732_s23, %s1732_s23, %s1733_s25  }
  0x45   : > { %s1884_s24 = sadd.s32 1, %s1725_s12   ;;  %s34_s28 = sadd.s32 1, %s1721_s11 }
  0x46   : > { %s31_s20 = ssub.s32 %s1725_s12, %s1884_s24  ;;  %p41_p12 = scmp.ne.s32.totalorder %s1721_s11, %s1717_s10 }
  0x47   : > { %p32_p7 = scmp.eq.s32.totalorder %s31_s20, 0  ;;  %p42_p1 = scmp.eq.s32.totalorder %s1725_s12, 0 }
  0x48   : > { %p1894_p9 = por %p239_p2, %p41_p12  ;;  %p1392_p13 = scmp.lt.s32.totalorder %s1725_s12, 2 }
  0x49   : > { %s1900_s22 = scalar_select %p32_p7, %s1721_s11, %s34_s28  }
  0x4a   : > { %s2065_s29 = scalar_select %p1894_p9, 1, 0 }
  0x4b   : > { %p43_p0 = por %p42_p1, %p41_p12  ;;  %s329_s18 = sand.u32 1, %s1721_s11  }
  0x4c   : > { %s1220_s21 = sshll.u32 %s329_s18, 4  ;;  %s1301_s23 = sshll.u32 %s1725_s12, 8 }
  0x4d   : > { %s1907_s19 = scalar_lea.hbm %s2039_s0, %s1301_s23  ;;  %s333_s20 = scalar_lea.vmem [#allocation2], %s1220_s21 }
  0x4e   : > { %s340_s26 = sshll.u32 %s333_s20, 4  ;;  %p1911_p2 = pnand %p1392_p13, %p43_p0  ;;  %s1909_s26 = int_to_ptr.vmem [resolvable:$true] %s340_s26 }
  0x4f   : > { %s1915_s28 = scalar_lea.sflag [#allocation3], %s329_s18  ;;  %s1625_s1 = scalar_lea.hbm %s1907_s19, 256 }
  0x50   : > { %p1626_p11 = scmp.ne.s32.totalorder %s1907_s19, %s1625_s1  ;;  %p1627_p3 = pneg %p1911_p2 }
  0x51   : > { %s1630_s21 = scalar_lea.hbm %s2039_s0, 512  ;;  %p1631_p12 = scmp.lt.s32.totalorder %s1907_s19, %s2039_s0 }
  0x52   : > { %p1628_p5 = pnand %p1627_p3, %p1626_p11  ;;  %p1632_p7 = scmp.lt.s32.totalorder %s1630_s21, %s1625_s1 }
  0x54   : > { %p1629_p10 = pneg %p1628_p5  ;;  %p1633_p1 = por %p1632_p7, %p1631_p12 }
  0x56   : > { %p1634_p13 = pnand %p1633_p1, %p1629_p10 }
  0x58   : > { %1637 = shalt.err (!%p1634_p13)
}
  0x59   : > { %s1638_s18 = scalar_lea.vmem %s1909_s26, 256  ;;  %s1735_s3 = smov [#allocation2]  }
  0x5a   : > { %p1639_p0 = scmp.ne.s32.totalorder %s1909_s26, %s1638_s18  ;;  %s1643_s5 = sshll.u32 %s1735_s3, 4  ;;  %s1644_s5 = int_to_ptr.vmem [resolvable:$false] %s1643_s5 }
  0x5b   : > { %s1645_s23 = scalar_lea.vmem %s1644_s5, 512  ;;  %p1646_p5 = scmp.lt.s32.totalorder %s1909_s26, %s1644_s5 }
  0x5c   : > { %p1641_p6 = pnand %p1639_p0, %p1627_p3  ;;  %p1647_p9 = scmp.lt.s32.totalorder %s1645_s23, %s1638_s18 }
  0x5e   : > { %p1642_p11 = pneg %p1641_p6  ;;  %p1648_p4 = por %p1647_p9, %p1646_p5 }
  0x60   : > { %p1649_p8 = pnand %p1648_p4, %p1642_p11 }
  0x62   : > { %1652 = shalt.err (!%p1649_p8)
}
  0x63   : > { %s2067_s1 = smov 8   ;;  %s2068_s25 = smov 128  }
  0x64   : > { %1383 = dma.hbm_to_vmem [thread:$0]  (!%p1911_p2), %s1907_s19, 256, %s1909_s26, %s1915_s28, %s2068_s25, %s2068_s25, %s2067_s1  }
  0x65   : > { %p2069_p6 = scmp.ne.s32.totalorder %s2060_s17, 0 }
  0x66   : > { %s1942_s3 = sand.u32 (!%p2069_p6), 1, %s1717_s10   ;;  %p2070_p4 = scmp.ne.s32.totalorder (!%p2069_p6), %s2058_s15, 0 }
  0x67   : > { %352 = sbr.rel (%p2069_p6) target bundleno = 986 (0x3da), region = 56  ;;  %s1224_s5 = sshll.u32 (!%p2069_p6), %s1942_s3, 4 }
  0x68   : > { %s355_s21 = scalar_lea.sflag (!%p2069_p6), [#allocation3], %s1942_s3  ;;  %s1948_s27 = scalar_lea.vmem (!%p2069_p6), [#allocation2], %s1224_s5 }
  0x6c   : > { %1696 = dma.done.wait (%p2070_p4), %s355_s21, 256  }
  0x6d   : > { %1698 = vsyncadd (%p2070_p4), %s355_s21, 4294967040  ;;  %p2071_p8 = scmp.eq.s32.totalorder %s1811_s13, 0 }
  0x6f   : > { %1700 = dma.done.wait (%p2071_p8), [#allocation6], 4096   ;;  %p2072_p9 = pmov %p2071_p8 }
  0x70   : > { %p2073_p2 = pmov %p2071_p8 }
  0x71   : > { %1702 = vsyncadd (%p2072_p9), [#allocation6], 4294963200 }
  0x72   : > { %1704 = dma.done.wait (%p2073_p2), [#allocation9], 4096   ;;  %p2074_p3 = pmov %p2073_p2 }
  0x73   : > { %v1736_v0 = vmov 0   ;;  %v1441_v1 = vld [vmem:[#allocation5 + $0x74] ss:$8 sps:$4 sm:$0xff]   ;;  %v1443_v2 = vld [vmem:[#allocation5 + $0x70] ss:$8 sps:$4 sm:$0xff]   ;;  %v1469_v16 = vld [vmem:[#allocation7 + $0x68] sm:$0xff]   ;;  %v433_v46 = vlaneseq }
  0x74   : > { %1706 = vsyncadd (%p2074_p3), [#allocation9], 4294963200  ;;  %555 = vmatprep.mubr.bf16.mxu0 %v1736_v0  ;;  %523 = vmatprep.subr.bf16.mxu0 %v1441_v1  ;;  %v1444_v3 = vld [vmem:[#allocation5 + $0x64] ss:$8 sps:$4 sm:$0xff]   ;;  %v1446_v4 = vld [vmem:[#allocation5 + $0x60] ss:$8 sps:$4 sm:$0xff]  }
  0x75   : > { %524 = vmatpush1.bf16.msra.mxu0 %v1443_v2  ;;  %v1447_v5 = vld [vmem:[#allocation5 + $0x54] ss:$8 sps:$4 sm:$0xff]   ;;  %v1449_v6 = vld [vmem:[#allocation5 + $0x50] ss:$8 sps:$4 sm:$0xff]   ;;  %v1450_v7 = vld [vmem:[#allocation5 + $0x44] ss:$8 sps:$4 sm:$0xff]  }
  0x76   : > { %525 = vmatprep.subr.bf16.mxu0 %v1444_v3  ;;  %v1452_v8 = vld [vmem:[#allocation5 + $0x40] ss:$8 sps:$4 sm:$0xff]   ;;  %v1453_v9 = vld [vmem:[#allocation5 + $0x34] ss:$8 sps:$4 sm:$0xff]   ;;  %v1455_v11 = vld [vmem:[#allocation5 + $0x30] ss:$8 sps:$4 sm:$0xff]  }
  0x77   : > { %v1465_v10 = vld [vmem:[#allocation7 + $0x78] sm:$0xff]   ;;  %v1456_v13 = vld [vmem:[#allocation5 + $0x24] ss:$8 sps:$4 sm:$0xff]   ;;  %v1467_v14 = vld [vmem:[#allocation7 + $0x70] sm:$0xff]   ;;  %v1964_v47 = vshrl.u32 %v433_v46, 7  ;;  %s408_s23 = scalar_lea.vmem [#allocation11], %s1224_s5 }
  0x78   : > { %v1466_v12 = vld [vmem:[#allocation7 + $0x38] sm:$0xff]   ;;  %1303 = vmatprep.subr.bf16.mxu1 %v1465_v10  ;;  %v1468_v15 = vld [vmem:[#allocation7 + $0x30] sm:$0xff]   ;;  %v1458_v17 = vld [vmem:[#allocation5 + $0x20] ss:$8 sps:$4 sm:$0xff]   ;;  %s1102_s1 = sshll.u32 %s408_s23, 4  ;;  %s1302_s25 = sshll.u32 %s1811_s13, 8  ;;  %s1991_s1 = int_to_ptr.vmem [resolvable:$true] %s1102_s1 }
  0x79   : > { %526 = vmatpush1.bf16.msra.mxu0 %v1446_v4  ;;  %1304 = vmatpush3.bf16.msra.mxu1 %v1466_v12  ;;  %v1459_v18 = vld [vmem:[#allocation5 + $0x14] ss:$8 sps:$4 sm:$0xff]   ;;  %v1470_v19 = vld [vmem:[#allocation7 + $0x28] sm:$0xff]   ;;  %v1471_v20 = vld [vmem:[#allocation7 + $0x60] sm:$0xff]   ;;  %v439_v48 = vsub.s32 1, %v1964_v47  ;;  %v435_v49 = vsub.s32 0, %v1964_v47  ;;  %s1996_s15 = scalar_lea.hbm %s2048_s9, %s1302_s25 }
  0x7a   : > { %527 = vmatprep.subr.bf16.mxu0 %v1447_v5  ;;  %1305 = vmatprep.subr.bf16.mxu1 %v1467_v14  ;;  %v1461_v21 = vld [vmem:[#allocation5 + $0x10] ss:$8 sps:$4 sm:$0xff]   ;;  %v1472_v22 = vld [vmem:[#allocation7 + $0x20] sm:$0xff]   ;;  %v1477_v32 = vld [vmem:[#allocation7 + $0x48] sm:$0xff]   ;;  %s1089_s5 = scalar_lea.sflag [#allocation4], %s1942_s3  ;;  %s1653_s17 = scalar_lea.vmem %s1991_s1, 256 }
  0x7b   : > { %v1462_v23 = vld [vmem:[#allocation5 + $0x4] ss:$8 sps:$4 sm:$0xff]   ;;  %v1473_v24 = vld [vmem:[#allocation7 + $0x58] sm:$0xff]   ;;  %v1464_v25 = vld [vmem:[#allocation5] ss:$8 sps:$4 sm:$0xff]   ;;  %p1654_p10 = scmp.ne.s32.totalorder %s1991_s1, %s1653_s17  ;;  %p2075_p12 = scmp.ne.s32.totalorder %s2065_s29, 0 }
  0x7c   : > { %v412_v26 = vld [vmem:[%s1948_s27] sm:$0xff]  ;;  %v413_v27 = vld [vmem:[%s1948_s27 + $0x8] sm:$0xff]  ;;  %s1737_s13 = smov [#allocation11]  }
  0x7d   : > { %528 = vmatpush1.bf16.msra.mxu0 %v1449_v6  ;;  %1306 = vmatpush3.bf16.msra.mxu1 %v1468_v15  ;;  %v1474_v28 = vld [vmem:[#allocation7 + $0x18] sm:$0xff]   ;;  %v414_v29 = vpack.c.bf16 %v413_v27, %v412_v26  ;;  %v1475_v30 = vld [vmem:[#allocation7 + $0x50] sm:$0xff]   ;;  %v1478_v33 = vld [vmem:[#allocation7 + $0x8] sm:$0xff]   ;;  %p1655_p7 = pnand %p1654_p10, %p2075_p12  ;;  %s1657_s26 = sshll.u32 %s1737_s13, 4  ;;  %s1658_s26 = int_to_ptr.vmem [resolvable:$false] %s1657_s26 }
  0x7e   : > { %529 = vmatprep.subr.bf16.mxu0 %v1450_v7  ;;  %1307 = vmatprep.subr.bf16.mxu1 %v1469_v16  ;;  %v1476_v31 = vld [vmem:[#allocation7 + $0x10] sm:$0xff]   ;;  %v1479_v34 = vld [vmem:[#allocation7 + $0x40] sm:$0xff]   ;;  %v1506_v10 = vld [vmem:[#allocation10 + $0x38] sm:$0xff]   ;;  %s1659_s19 = scalar_lea.vmem %s1658_s26, 512  ;;  %p1660_p13 = scmp.lt.s32.totalorder %s1991_s1, %s1658_s26 }
  0x7f   : > { %v1480_v35 = vld [vmem:[#allocation7] sm:$0xff]   ;;  %v1481_v36 = vld [vmem:[#allocation8 + $0x70] ss:$8 sps:$4 sm:$0xff]   ;;  %v1483_v37 = vld [vmem:[#allocation8 + $0x74] ss:$8 sps:$4 sm:$0xff]   ;;  %p1656_p1 = pneg %p1655_p7  ;;  %p1661_p0 = scmp.lt.s32.totalorder %s1659_s19, %s1653_s17 }
  0x80   : > { %v1486_v38 = vld [vmem:[#allocation8 + $0x64] ss:$8 sps:$4 sm:$0xff]   ;;  %v1484_v39 = vld [vmem:[#allocation8 + $0x60] ss:$8 sps:$4 sm:$0xff]   ;;  %v1489_v40 = vld [vmem:[#allocation8 + $0x54] ss:$8 sps:$4 sm:$0xff]  }
  0x81   : > { %530 = vmatpush1.bf16.msra.mxu0 %v1452_v8  ;;  %1308 = vmatpush3.bf16.msra.mxu1 %v1470_v19  ;;  %v1487_v41 = vld [vmem:[#allocation8 + $0x50] ss:$8 sps:$4 sm:$0xff]   ;;  %v1492_v42 = vld [vmem:[#allocation8 + $0x44] ss:$8 sps:$4 sm:$0xff]   ;;  %v1490_v43 = vld [vmem:[#allocation8 + $0x40] ss:$8 sps:$4 sm:$0xff]   ;;  %p1662_p11 = por %p1661_p0, %p1660_p13 }
  0x82   : > { %531 = vmatprep.subr.bf16.mxu0 %v1453_v9  ;;  %1309 = vmatprep.subr.bf16.mxu1 %v1471_v20  ;;  %v1495_v44 = vld [vmem:[#allocation8 + $0x34] ss:$8 sps:$4 sm:$0xff]   ;;  %v1493_v45 = vld [vmem:[#allocation8 + $0x30] ss:$8 sps:$4 sm:$0xff]   ;;  %v431_v50 = vld [vmem:[%s2041_s2] sm:$0x3] }
  0x83   : > { %v440_v52 = vrot.slane %v431_v50, %v439_v48  ;;  %v436_v53 = vrot.slane %v431_v50, %v435_v49  ;;  %v1498_v3 = vld [vmem:[#allocation8 + $0x24] ss:$8 sps:$4 sm:$0xff]   ;;  %v1496_v4 = vld [vmem:[#allocation8 + $0x20] ss:$8 sps:$4 sm:$0xff]   ;;  %v1501_v5 = vld [vmem:[#allocation8 + $0x14] ss:$8 sps:$4 sm:$0xff]   ;;  %p1663_p5 = pnand %p1662_p11, %p1656_p1 }
  0x84   : > { %v1499_v6 = vld [vmem:[#allocation8 + $0x10] ss:$8 sps:$4 sm:$0xff]   ;;  %v1504_v7 = vld [vmem:[#allocation8 + $0x4] ss:$8 sps:$4 sm:$0xff]   ;;  %v1502_v8 = vld [vmem:[#allocation8] ss:$8 sps:$4 sm:$0xff]  }
  0x85   : > { %532 = vmatpush1.bf16.msra.mxu0 %v1455_v11  ;;  %1310 = vmatpush3.bf16.msra.mxu1 %v1472_v22  ;;  %v1505_v9 = vld [vmem:[#allocation10 + $0x78] sm:$0xff]   ;;  %v1507_v11 = vld [vmem:[#allocation10 + $0x70] sm:$0xff]   ;;  %v1510_v14 = vld [vmem:[#allocation10 + $0x28] sm:$0xff]  }
  0x86   : > { %533 = vmatprep.subr.bf16.mxu0 %v1456_v13  ;;  %1311 = vmatprep.subr.bf16.mxu1 %v1473_v24  ;;  %v1508_v12 = vld [vmem:[#allocation10 + $0x30] sm:$0xff]   ;;  %v1509_v13 = vld [vmem:[#allocation10 + $0x68] sm:$0xff]   ;;  %v1511_v15 = vld [vmem:[#allocation10 + $0x60] sm:$0xff]  }
  0x87   : > { %v1512_v16 = vld [vmem:[#allocation10 + $0x20] sm:$0xff]  }
  0x88   : > { %v1246_v22 = vld [vmem:[%s2043_s4] ss:$0 sm:$0xff] }
  0x89   : > { %534 = vmatpush1.bf16.msra.mxu0 %v1458_v17  ;;  %1312 = vmatpush3.bf16.msra.mxu1 %v1474_v28  ;;  %v1513_v17 = vld [vmem:[#allocation10 + $0x58] sm:$0xff]   ;;  %v1279_v47 = vld [vmem:[%s2047_s8] ss:$0 sm:$0xff] }
  0x8a   : > { %535 = vmatprep.subr.bf16.mxu0 %v1459_v18  ;;  %1313 = vmatprep.subr.bf16.mxu1 %v1475_v30  ;;  %v1514_v18 = vld [vmem:[#allocation10 + $0x18] sm:$0xff]  }
  0x8d   : > { %536 = vmatpush1.bf16.msra.mxu0 %v1461_v21  ;;  %1314 = vmatpush3.bf16.msra.mxu1 %v1476_v31  ;;  %v1515_v31 = vld [vmem:[#allocation10 + $0x50] sm:$0xff]  }
  0x8e   : > { %537 = vmatprep.subr.bf16.mxu0 %v1462_v23  ;;  %1315 = vmatprep.subr.bf16.mxu1 %v1477_v32  ;;  %v1516_v32 = vld [vmem:[#allocation10 + $0x10] sm:$0xff]  }
  0x91   : > { %538 = vmatpush1.bf16.msra.mxu0 %v1464_v25  ;;  %1316 = vmatpush3.bf16.msra.mxu1 %v1478_v33  ;;  %v1517_v33 = vld [vmem:[#allocation10 + $0x48] sm:$0xff]  }
  0x92   : > { %1317 = vmatprep.subr.bf16.mxu1 %v1479_v34  ;;  %859 = vmatprep.subr.bf16.mxu0 %v1483_v37  ;;  %v1518_v34 = vld [vmem:[#allocation10 + $0x8] sm:$0xff]   ;;  %v767_v37 = vld [vmem:[%s2045_s6] sm:$0x3] }
  0x94   : > { %556 = vmatmul.mubr.bf16.vlgmr.msra.gmra.mxu0 %v414_v29 }
  0x95   : > { %891 = vmatprep.mubr.bf16.mxu0 %v1736_v0  ;;  %1318 = vmatpush3.bf16.msra.mxu1 %v1480_v35  ;;  %v1519_v35 = vld [vmem:[#allocation10 + $0x40] sm:$0xff]  }
  0x96   : > { %860 = vmatpush1.bf16.msra.mxu0 %v1481_v36  ;;  %1325 = vmatprep.subr.bf16.mxu1 %v1505_v9  ;;  %v1520_v36 = vld [vmem:[#allocation10] sm:$0xff]  }
  0x97   : > { %861 = vmatprep.subr.bf16.mxu0 %v1486_v38 }
  0x9a   : > { %862 = vmatpush1.bf16.msra.mxu0 %v1484_v39  ;;  %v776_v39 = vrot.slane %v767_v37, %v439_v48 }
  0x9b   : > { %863 = vmatprep.subr.bf16.mxu0 %v1489_v40  ;;  %v772_v40 = vrot.slane %v767_v37, %v435_v49 }
  0x9e   : > { %864 = vmatpush1.bf16.msra.mxu0 %v1487_v41 }
  0x9f   : > { %865 = vmatprep.subr.bf16.mxu0 %v1492_v42 }
  0xa2   : > { %866 = vmatpush1.bf16.msra.mxu0 %v1490_v43 }
  0xa3   : > { %867 = vmatprep.subr.bf16.mxu0 %v1495_v44 }
  0xa6   : > { %868 = vmatpush1.bf16.msra.mxu0 %v1493_v45 }
  0xa7   : > { %869 = vmatprep.subr.bf16.mxu0 %v1498_v3 }
  0xaa   : > { %870 = vmatpush1.bf16.msra.mxu0 %v1496_v4 }
  0xab   : > { %871 = vmatprep.subr.bf16.mxu0 %v1501_v5 }
  0xae   : > { %872 = vmatpush1.bf16.msra.mxu0 %v1499_v6 }
  0xaf   : > { %873 = vmatprep.subr.bf16.mxu0 %v1504_v7 }
  0xb2   : > { %874 = vmatpush1.bf16.msra.mxu0 %v1502_v8 }
 0x154   : > { %v557_v51 = vpop.f32.mrf.mxu0 }
 0x155   : > { %v558_v58 = vadd.f32 %v557_v51, %v436_v53 }
 0x156   : > { %v559_v54 = vpop.f32.mrf.mxu0 }
 0x157   : > { %v560_v56 = vadd.f32 %v559_v54, %v440_v52  ;;  %v566_v0 = vmax.f32 %v558_v58, 0.0 }
 0x158   : > { %v561_v55 = vpop.f32.mrf.mxu0 }
 0x159   : > { %v562_v57 = vadd.f32 %v561_v55, %v436_v53  ;;  %v567_v62 = vmax.f32 %v560_v56, 0.0 }
 0x15a   : > { %v563_v59 = vpop.f32.mrf.mxu0 }
 0x15b   : > { %v564_v60 = vadd.f32 %v563_v59, %v440_v52  ;;  %v568_v61 = vmax.f32 %v562_v57, 0.0 }
 0x15d   : > { %v569_v63 = vmax.f32 %v564_v60, 0.0  ;;  %v570_v2 = vpack.c.bf16 %v568_v61, %v566_v0 }
 0x15f   : > { %v571_v1 = vpack.c.bf16 %v569_v63, %v567_v62 }
 0x161   : > { %739 = vmatprep.mubr.bf16.mxu1 %v571_v1 }
 0x162   : > { %740 = vmatmul.mubr.bf16.vlgmr.msra.gmra.mxu1 %v570_v2 }
 0x163   : > { %1326 = vmatpush3.bf16.msra.mxu1 %v1506_v10 }
 0x164   : > { %1327 = vmatprep.subr.bf16.mxu1 %v1507_v11 }
 0x167   : > { %1328 = vmatpush3.bf16.msra.mxu1 %v1508_v12 }
 0x168   : > { %1329 = vmatprep.subr.bf16.mxu1 %v1509_v13 }
 0x16b   : > { %1330 = vmatpush3.bf16.msra.mxu1 %v1510_v14 }
 0x16c   : > { %1331 = vmatprep.subr.bf16.mxu1 %v1511_v15 }
 0x16f   : > { %1332 = vmatpush3.bf16.msra.mxu1 %v1512_v16 }
 0x170   : > { %1333 = vmatprep.subr.bf16.mxu1 %v1513_v17 }
 0x173   : > { %1334 = vmatpush3.bf16.msra.mxu1 %v1514_v18 }
 0x174   : > { %1335 = vmatprep.subr.bf16.mxu1 %v1515_v31 }
 0x177   : > { %1336 = vmatpush3.bf16.msra.mxu1 %v1516_v32 }
 0x178   : > { %1337 = vmatprep.subr.bf16.mxu1 %v1517_v33 }
 0x17b   : > { %1338 = vmatpush3.bf16.msra.mxu1 %v1518_v34 }
 0x17c   : > { %1339 = vmatprep.subr.bf16.mxu1 %v1519_v35 }
 0x17f   : > { %1340 = vmatpush3.bf16.msra.mxu1 %v1520_v36 }
 0x222   : > { %v1319_v19 = vpop.f32.mrf.mxu1 }
 0x224   : > { %v1320_v20 = vpop.f32.mrf.mxu1 }
 0x225   : > { %v1321_v21 = vadd.f32 %v1320_v20, %v1319_v19 }
 0x226   : > { %v1322_v23 = vpop.f32.mrf.mxu1 }
 0x227   : > { %v742_v25 = vadd.f32 %v1321_v21, %v1246_v22 }
 0x228   : > { %v1323_v24 = vpop.f32.mrf.mxu1 }
 0x229   : > { %v1324_v26 = vadd.f32 %v1323_v24, %v1322_v23  ;;  %v748_v28 = vmax.f32 %v742_v25, 0.0 }
 0x22b   : > { %v745_v27 = vadd.f32 %v1324_v26, %v1246_v22 }
 0x22d   : > { %v749_v29 = vmax.f32 %v745_v27, 0.0 }
 0x22f   : > { %v750_v30 = vpack.c.bf16 %v749_v29, %v748_v28 }
 0x231   : > { %892 = vmatmul.mubr.bf16.vlgmr.msra.gmra.mxu0 %v750_v30 }
 0x2f1   : > { %v893_v38 = vpop.f32.mrf.mxu0 }
 0x2f2   : > { %v894_v45 = vadd.f32 %v893_v38, %v772_v40 }
 0x2f3   : > { %v895_v41 = vpop.f32.mrf.mxu0 }
 0x2f4   : > { %v896_v43 = vadd.f32 %v895_v41, %v776_v39  ;;  %v902_v54 = vmax.f32 %v894_v45, 0.0 }
 0x2f5   : > { %v897_v42 = vpop.f32.mrf.mxu0 }
 0x2f6   : > { %v898_v44 = vadd.f32 %v897_v42, %v772_v40  ;;  %v903_v52 = vmax.f32 %v896_v43, 0.0 }
 0x2f7   : > { %v899_v46 = vpop.f32.mrf.mxu0 }
 0x2f8   : > { %v900_v50 = vadd.f32 %v899_v46, %v776_v39  ;;  %v904_v51 = vmax.f32 %v898_v44, 0.0 }
 0x2fa   : > { %v905_v53 = vmax.f32 %v900_v50, 0.0  ;;  %v906_v56 = vpack.c.bf16 %v904_v51, %v902_v54 }
 0x2fc   : > { %v907_v55 = vpack.c.bf16 %v905_v53, %v903_v52 }
 0x2fe   : > { %1075 = vmatprep.mubr.bf16.mxu1 %v907_v55 }
 0x2ff   : > { %1076 = vmatmul.mubr.bf16.vlgmr.msra.gmra.mxu1 %v906_v56 }
 0x3bf   : > { %v1341_v48 = vpop.f32.mrf.mxu1 }
 0x3c1   : > { %v1342_v49 = vpop.f32.mrf.mxu1 }
 0x3c2   : > { %v1343_v57 = vadd.f32 %v1342_v49, %v1341_v48 }
 0x3c3   : > { %v1344_v58 = vpop.f32.mrf.mxu1 }
 0x3c4   : > { %v1078_v59 = vadd.f32 %v1343_v57, %v1279_v47 }
 0x3c5   : > { %v1345_v60 = vpop.f32.mrf.mxu1 }
 0x3c6   : > { %v1084_v61 = vmax.f32 %v1078_v59, 0.0  ;;  %v1346_v62 = vadd.f32 %v1345_v60, %v1344_v58 }
 0x3c8   : > { %1086 = vst [vmem:[%s408_s23] sm:$0xff] %v1084_v61  ;;  %v1081_v63 = vadd.f32 %v1346_v62, %v1279_v47 }
 0x3ca   : > { %v1085_v0 = vmax.f32 %v1081_v63, 0.0 }
 0x3cc   : > { %1087 = vst [vmem:[%s408_s23 + $0x8] sm:$0xff] %v1085_v0 }
 0x3cd   : > { %1666 = shalt.err (!%p1663_p5)
}
 0x3ce   : > { %s1667_s28 = scalar_lea.hbm %s1996_s15, 256  ;;  %s1671_s18 = scalar_lea.hbm %s2048_s9, 512 }
 0x3cf   : > { %p1668_p6 = scmp.ne.s32.totalorder %s1996_s15, %s1667_s28  ;;  %p1672_p9 = scmp.lt.s32.totalorder %s1996_s15, %s2048_s9 }
 0x3d0   : > { %p1673_p2 = scmp.lt.s32.totalorder %s1671_s18, %s1667_s28 }
 0x3d1   : > { %p1669_p4 = pnand %p1668_p6, %p2075_p12 }
 0x3d2   : > { %p1674_p3 = por %p1673_p2, %p1672_p9 }
 0x3d3   : > { %p1670_p8 = pneg %p1669_p4 }
 0x3d5   : > { %p1675_p10 = pnand %p1674_p3, %p1670_p8 }
 0x3d7   : > { %1678 = shalt.err (!%p1675_p10)
}
 0x3d8   : > { %s1738_s21 = smov 128   ;;  %s1739_s27 = smov 8  }
 0x3d9   : > { %1365 = dma.vmem_to_hbm [thread:$0]  (%p2075_p12), %s1991_s1, 256, %s1996_s15, %s1089_s5, %s1738_s21, %s1738_s21, %s1739_s27  }
 0x3da PF: > { %s1117_s17 = sand.u32 1, %s1713_s30   ;;  %p2076_p7 = scmp.ne.s32.totalorder %s2059_s16, 0 }
 0x3db   : > { %p2077_p1 = scmp.ge.s32.totalorder %s1725_s12, 2  ;;  %s1118_s13 = scalar_lea.sflag [#allocation4], %s1117_s17 }
 0x3dd   : > { %p1385_p13 = pnand %p2077_p1, %p2076_p7 }
 0x3df   : > { %p1386_p0 = pneg %p1385_p13 }
 0x3e1   : > { %1708 = dma.done.wait (%p1386_p0), %s1118_s13, 256  }
 0x3e2   : > { %1710 = vsyncadd (%p1386_p0), %s1118_s13, 4294967040  ;;  %p24_p11 = scmp.ge.s32.totalorder %s1884_s24, 4   ;;  %s2078_s30 = smov %s1717_s10 }
 0x3e3   : > { %s2079_s10 = smov %s1721_s11  ;;  %s2080_s11 = smov %s1900_s22 }
 0x3e4   : > { %s2081_s12 = smov %s1884_s24  ;;  %26 = sbr.rel (!%p24_p11) target bundleno = 11 (0xb), region = 117 }
 0x3e9   :  { %1123 = vsyncpa [#allocation3], 1 }
 0x3ea   :  { %1125 = vsyncpa [#allocation3 + $0x1], 1 }
 0x3eb   :  { %1126 = vsyncpa [#allocation6], 1 }
 0x3ec   :  { %1127 = vsyncpa [#allocation9], 1 }
 0x3ed   :  { %1128 = vsyncpa [#allocation4], 1 }
 0x3ee   :  { %1130 = vsyncpa [#allocation4 + $0x1], 1 }

</bundles_post_ra>
